<compile_context>
chip_gen: v7x
topology: tpu7x:2x2x1
jax: 0.10.0
libtpu: 0.0.40
codegen_flags: <defaults>
</compile_context>

<pallas_src>
import functools

import jax
import jax.numpy as jnp
from jax import lax
from jax.experimental import pallas as pl
from jax.experimental.pallas import tpu as pltpu

HIDDEN = 512
TB_DEFAULT = 512          # batch tile; VMEM use stays < 4 MiB even double-buffered


def _leaky_relu(x, slope=0.2):
    # slope < 1  =>  max(x, slope*x) == LeakyReLU(x)
    return jnp.maximum(x, slope * x)


def _round_up(x, m):
    return (x + m - 1) // m * m


def dis_mlp_kernel(x_ref, lbl_ref,
                   embb1_ref, w1_ref,
                   w2_ref, b2_ref,
                   w3_ref, b3_ref,
                   w4_ref, b4_ref,
                   out_ref):
    """One batch tile; all weights + the folded-embedding table are VMEM-resident."""
    tb = x_ref.shape[0]
    c_pad = embb1_ref.shape[0]

    # Layer 1 (input part): x @ W1[C:]  (bf16 MXU, f32 accum)
    h = jnp.dot(x_ref[...].astype(jnp.bfloat16), w1_ref[...],
                preferred_element_type=jnp.float32)

    # Layer 1 (label part): in-kernel lookup of the folded (label_emb@W1[:C]+b1)
    # row via a one-hot against the resident table.  one-hot (0/1) x bf16 with
    # f32 accumulation reproduces the gather exactly.
    lbl = lbl_ref[...]                                              # [tb, 1] int32
    cls = lax.broadcasted_iota(jnp.int32, (tb, c_pad), 1)
    onehot = (cls == lbl).astype(jnp.bfloat16)                      # [tb, c_pad]
    h = h + jnp.dot(onehot, embb1_ref[...],
                    preferred_element_type=jnp.float32)
    h = _leaky_relu(h)

    # Layer 2  (Dropout(0.4) -> identity in eval mode)
    h = jnp.dot(h.astype(jnp.bfloat16), w2_ref[...],
                preferred_element_type=jnp.float32) + b2_ref[...]
    h = _leaky_relu(h)

    # Layer 3  (Dropout(0.4) -> identity in eval mode)
    h = jnp.dot(h.astype(jnp.bfloat16), w3_ref[...],
                preferred_element_type=jnp.float32) + b3_ref[...]
    h = _leaky_relu(h)

    # Layer 4: N=1 output -> lane multiply + reduce on VPU/XLU (skip the MXU pass)
    logit = jnp.sum(h * w4_ref[...], axis=-1, keepdims=True) + b4_ref[...]
    out_ref[...] = jax.nn.sigmoid(logit)


@functools.partial(jax.jit, static_argnames=("block_b",))
def dis_forward(params, inp, label, block_b=TB_DEFAULT):
    """params: dict from init_params. inp: [B, F] f32. label: [B] int32."""
    B, F = inp.shape
    label2d = label.reshape(B, 1).astype(jnp.int32)

    # Batch tile: multiple of 8 sublanes; for medium/large B aim for >=2 grid
    # steps so "parallel" can shard tiles across v7x's two TensorCores.
    if B <= 8:
        tb = 8
    else:
        tb = min(block_b, _round_up(pl.cdiv(B, 2), 8))
    pad = (-B) % tb
    if pad:
        inp = jnp.pad(inp, ((0, pad), (0, 0)))
        label2d = jnp.pad(label2d, ((0, pad), (0, 0)))
    Bp = B + pad
    grid = (Bp // tb,)

    tile = lambda i: (i, 0)      # activation/label/output tiles march over batch
    rep = lambda i: (0, 0)       # weights / tables stay VMEM-resident

    c_pad = params["emb_b1"].shape[0]

    out = pl.pallas_call(
        dis_mlp_kernel,
        out_shape=jax.ShapeDtypeStruct((Bp, 1), jnp.float32),
        grid=grid,
        in_specs=[
            pl.BlockSpec((tb, F), tile),            # input tile            f32
            pl.BlockSpec((tb, 1), tile),            # labels                int32
            pl.BlockSpec((c_pad, HIDDEN), rep),     # folded emb+b1 table   bf16
            pl.BlockSpec((F, HIDDEN), rep),         # w1x                   bf16
            pl.BlockSpec((HIDDEN, HIDDEN), rep),    # w2                    bf16
            pl.BlockSpec((1, HIDDEN), rep),         # b2                    f32
            pl.BlockSpec((HIDDEN, HIDDEN), rep),    # w3                    bf16
            pl.BlockSpec((1, HIDDEN), rep),         # b3                    f32
            pl.BlockSpec((1, HIDDEN), rep),         # w4 row                f32
            pl.BlockSpec((1, 1), rep),              # b4                    f32
        ],
        out_specs=pl.BlockSpec((tb, 1), tile),
        compiler_params=pltpu.CompilerParams(
            dimension_semantics=("parallel",),      # shard batch tiles across TCs (v7x)
        ),
    )(inp, label2d,
      params["emb_b1"],
      params["w1x"],
      params["w2"], params["b2"],
      params["w3"], params["b3"],
      params["w4"], params["b4"])
    return out[:B]


def init_params(key, n_features, n_classes):
    """Deterministic init matching PyTorch default initializers' distributions."""
    ks = jax.random.split(key, 9)
    in0 = n_classes + n_features

    def linear(kw, kb, fan_in, fan_out):
        bound = 1.0 / jnp.sqrt(fan_in)
        w = jax.random.uniform(kw, (fan_in, fan_out), jnp.float32, -bound, bound)
        b = jax.random.uniform(kb, (1, fan_out), jnp.float32, -bound, bound)
        return w, b

    w1, b1 = linear(ks[0], ks[1], in0, HIDDEN)
    w2, b2 = linear(ks[2], ks[3], HIDDEN, HIDDEN)
    w3, b3 = linear(ks[4], ks[5], HIDDEN, HIDDEN)
    w4, b4 = linear(ks[6], ks[7], HIDDEN, 1)
    label_emb = jax.random.normal(ks[8], (n_classes, n_classes), jnp.float32)

    # Exact (f32) algebraic fold of embedding + concat + first bias, then padded
    # to a sublane-friendly row count and quantized to bf16 for the resident table.
    emb_b1 = label_emb @ w1[:n_classes] + b1            # [n_classes, 512] f32
    c_pad = max(8, _round_up(n_classes, 8))
    emb_b1 = jnp.pad(emb_b1, ((0, c_pad - n_classes), (0, 0))).astype(jnp.bfloat16)

    return dict(
        label_emb=label_emb,
        emb_b1=emb_b1,                                  # [c_pad, 512] bf16
        w1x=w1[n_classes:].astype(jnp.bfloat16),        # [F, 512]
        w2=w2.astype(jnp.bfloat16), b2=b2,
        w3=w3.astype(jnp.bfloat16), b3=b3,
        w4=w4.reshape(1, HIDDEN),                       # lane-major row for VPU reduce
        b4=b4.reshape(1, 1),
        # full-precision originals kept only for the reference checks below
        w1_full=w1, b1_full=b1, w2_full=w2, w3_full=w3, w4_full=w4, b4_full=b4,
    )


def reference_forward_matched(params, inp, label):
    """Pure-JAX reference implementing exactly the kernel's math (bf16 dots, f32 accum)."""
    e1 = params["emb_b1"][label].astype(jnp.float32)
    h = jnp.dot(inp.astype(jnp.bfloat16), params["w1x"],
                preferred_element_type=jnp.float32) + e1
    h = _leaky_relu(h)
    h = jnp.dot(h.astype(jnp.bfloat16), params["w2"],
                preferred_element_type=jnp.float32) + params["b2"]
    h = _leaky_relu(h)
    h = jnp.dot(h.astype(jnp.bfloat16), params["w3"],
                preferred_element_type=jnp.float32) + params["b3"]
    h = _leaky_relu(h)
    logit = jnp.sum(h * params["w4"], axis=-1, keepdims=True) + params["b4"]
    return jax.nn.sigmoid(logit)


def reference_forward_f32(params, inp, label):
    """Original-module f32 semantics (embedding + concat + f32 matmuls)."""
    emb = params["label_emb"][label]
    x = jnp.concatenate([emb, inp], axis=1)
    h = _leaky_relu(x @ params["w1_full"] + params["b1_full"])
    h = _leaky_relu(h @ params["w2_full"] + params["b2"])
    h = _leaky_relu(h @ params["w3_full"] + params["b3"])
    return jax.nn.sigmoid(h @ params["w4_full"] + params["b4_full"])


if __name__ == "__main__":
    n_features = 32     # args.n_features
    n_classes = 4       # args.n_classes
    batch = 8

    key = jax.random.PRNGKey(0)
    k_params, k_x, k_lbl = jax.random.split(key, 3)

    params = init_params(k_params, n_features, n_classes)
    x = jax.random.normal(k_x, (batch, n_features), jnp.float32)
    label = jax.random.randint(k_lbl, (batch,), 0, n_classes, jnp.int32)

    out = dis_forward(params, x, label)
    out = jax.block_until_ready(out)
    assert out.shape == (batch, 1)

    # Tight check: kernel == identical-math JAX reference (bf16 dots, f32 accum).
    ref_matched = reference_forward_matched(params, x, label)
    assert jnp.allclose(out, ref_matched, atol=1e-4, rtol=1e-4), \
        f"max diff vs matched ref: {jnp.max(jnp.abs(out - ref_matched))}"

    # Loose check: kernel ~= original full-f32 module semantics (bf16 weight quant).
    ref_f32 = reference_forward_f32(params, x, label)
    assert jnp.allclose(out, ref_f32, atol=5e-2), \
        f"max diff vs f32 ref: {jnp.max(jnp.abs(out - ref_f32))}"

    print("KERNEL_OK")
</pallas_src>

<mosaic_0001>
module attributes {stable_mosaic.version = 11 : i64} {
  func.func @dis_mlp_kernel(%arg0: i32, %arg1: memref<8x32xf32, #tpu.memory_space<vmem>>, %arg2: memref<8x1xi32, #tpu.memory_space<vmem>>, %arg3: memref<8x512xbf16, #tpu.memory_space<vmem>>, %arg4: memref<32x512xbf16, #tpu.memory_space<vmem>>, %arg5: memref<512x512xbf16, #tpu.memory_space<vmem>>, %arg6: memref<1x512xf32, #tpu.memory_space<vmem>>, %arg7: memref<512x512xbf16, #tpu.memory_space<vmem>>, %arg8: memref<1x512xf32, #tpu.memory_space<vmem>>, %arg9: memref<1x512xf32, #tpu.memory_space<vmem>>, %arg10: memref<1x1xf32, #tpu.memory_space<vmem>>, %arg11: memref<8x1xf32, #tpu.memory_space<vmem>>) attributes {dimension_semantics = [#tpu.dimension_semantics<parallel>], iteration_bounds = array<i64: 1>, scalar_prefetch = 0 : i64, scratch_operands = 0 : i64, tpu.core_type = #tpu.core_type<tc>, window_params = [{transform_indices = @transform_0, window_bounds = array<i64: 8, 32>}, {transform_indices = @transform_1, window_bounds = array<i64: 8, 1>}, {pipeline_mode = #tpu.pipeline_mode<synchronous>, transform_indices = @transform_2, window_bounds = array<i64: 8, 512>}, {pipeline_mode = #tpu.pipeline_mode<synchronous>, transform_indices = @transform_3, window_bounds = array<i64: 32, 512>}, {pipeline_mode = #tpu.pipeline_mode<synchronous>, transform_indices = @transform_4, window_bounds = array<i64: 512, 512>}, {pipeline_mode = #tpu.pipeline_mode<synchronous>, transform_indices = @transform_5, window_bounds = array<i64: 1, 512>}, {pipeline_mode = #tpu.pipeline_mode<synchronous>, transform_indices = @transform_6, window_bounds = array<i64: 512, 512>}, {pipeline_mode = #tpu.pipeline_mode<synchronous>, transform_indices = @transform_7, window_bounds = array<i64: 1, 512>}, {pipeline_mode = #tpu.pipeline_mode<synchronous>, transform_indices = @transform_8, window_bounds = array<i64: 1, 512>}, {pipeline_mode = #tpu.pipeline_mode<synchronous>, transform_indices = @transform_9, window_bounds = array<i64: 1, 1>}, {transform_indices = @transform_10, window_bounds = array<i64: 8, 1>}]} {
    %c0 = arith.constant 0 : index
    %c0_0 = arith.constant 0 : index
    %0 = vector.load %arg1[%c0, %c0_0] : memref<8x32xf32, #tpu.memory_space<vmem>>, vector<8x32xf32>
    %1 = arith.truncf %0 : vector<8x32xf32> to vector<8x32xbf16>
    %c0_1 = arith.constant 0 : index
    %c0_2 = arith.constant 0 : index
    %2 = vector.load %arg4[%c0_1, %c0_2] : memref<32x512xbf16, #tpu.memory_space<vmem>>, vector<32x512xbf16>
    %cst = arith.constant dense<0.000000e+00> : vector<8x512xf32>
    %3 = tpu.matmul %1, %2, %cst {dimension_numbers = #tpu.dot_dimension_numbers<[1], [0], [0], [1], [0, 0, 1, 1], [], []>} : vector<8x32xbf16>, vector<32x512xbf16>, vector<8x512xf32> -> vector<8x512xf32>
    %c0_3 = arith.constant 0 : index
    %c0_4 = arith.constant 0 : index
    %4 = vector.load %arg2[%c0_3, %c0_4] : memref<8x1xi32, #tpu.memory_space<vmem>>, vector<8x1xi32>
    %5 = tpu.iota {dimensions = array<i32: 1>} : vector<8x8xi32>
    %6 = vector.broadcast %4 : vector<8x1xi32> to vector<8x8xi32>
    %7 = arith.cmpi eq, %5, %6 : vector<8x8xi32>
    %8 = arith.extui %7 : vector<8x8xi1> to vector<8x8xi32>
    %9 = arith.sitofp %8 : vector<8x8xi32> to vector<8x8xf32>
    %10 = arith.truncf %9 : vector<8x8xf32> to vector<8x8xbf16>
    %c0_5 = arith.constant 0 : index
    %c0_6 = arith.constant 0 : index
    %11 = vector.load %arg3[%c0_5, %c0_6] : memref<8x512xbf16, #tpu.memory_space<vmem>>, vector<8x512xbf16>
    %cst_7 = arith.constant dense<0.000000e+00> : vector<8x512xf32>
    %12 = tpu.matmul %10, %11, %cst_7 {dimension_numbers = #tpu.dot_dimension_numbers<[1], [0], [0], [1], [0, 0, 1, 1], [], []>} : vector<8x8xbf16>, vector<8x512xbf16>, vector<8x512xf32> -> vector<8x512xf32>
    %13 = arith.addf %3, %12 : vector<8x512xf32>
    %cst_8 = arith.constant 2.000000e-01 : f32
    %14 = vector.broadcast %cst_8 : f32 to vector<8x512xf32>
    %15 = arith.mulf %14, %13 : vector<8x512xf32>
    %16 = arith.maximumf %13, %15 : vector<8x512xf32>
    %17 = arith.truncf %16 : vector<8x512xf32> to vector<8x512xbf16>
    %c0_9 = arith.constant 0 : index
    %c0_10 = arith.constant 0 : index
    %18 = vector.load %arg5[%c0_9, %c0_10] : memref<512x512xbf16, #tpu.memory_space<vmem>>, vector<512x512xbf16>
    %cst_11 = arith.constant dense<0.000000e+00> : vector<8x512xf32>
    %19 = tpu.matmul %17, %18, %cst_11 {dimension_numbers = #tpu.dot_dimension_numbers<[1], [0], [0], [1], [0, 0, 1, 1], [], []>} : vector<8x512xbf16>, vector<512x512xbf16>, vector<8x512xf32> -> vector<8x512xf32>
    %c0_12 = arith.constant 0 : index
    %c0_13 = arith.constant 0 : index
    %20 = vector.load %arg6[%c0_12, %c0_13] : memref<1x512xf32, #tpu.memory_space<vmem>>, vector<1x512xf32>
    %21 = vector.broadcast %20 : vector<1x512xf32> to vector<8x512xf32>
    %22 = arith.addf %19, %21 : vector<8x512xf32>
    %cst_14 = arith.constant 2.000000e-01 : f32
    %23 = vector.broadcast %cst_14 : f32 to vector<8x512xf32>
    %24 = arith.mulf %23, %22 : vector<8x512xf32>
    %25 = arith.maximumf %22, %24 : vector<8x512xf32>
    %26 = arith.truncf %25 : vector<8x512xf32> to vector<8x512xbf16>
    %c0_15 = arith.constant 0 : index
    %c0_16 = arith.constant 0 : index
    %27 = vector.load %arg7[%c0_15, %c0_16] : memref<512x512xbf16, #tpu.memory_space<vmem>>, vector<512x512xbf16>
    %cst_17 = arith.constant dense<0.000000e+00> : vector<8x512xf32>
    %28 = tpu.matmul %26, %27, %cst_17 {dimension_numbers = #tpu.dot_dimension_numbers<[1], [0], [0], [1], [0, 0, 1, 1], [], []>} : vector<8x512xbf16>, vector<512x512xbf16>, vector<8x512xf32> -> vector<8x512xf32>
    %c0_18 = arith.constant 0 : index
    %c0_19 = arith.constant 0 : index
    %29 = vector.load %arg8[%c0_18, %c0_19] : memref<1x512xf32, #tpu.memory_space<vmem>>, vector<1x512xf32>
    %30 = vector.broadcast %29 : vector<1x512xf32> to vector<8x512xf32>
    %31 = arith.addf %28, %30 : vector<8x512xf32>
    %cst_20 = arith.constant 2.000000e-01 : f32
    %32 = vector.broadcast %cst_20 : f32 to vector<8x512xf32>
    %33 = arith.mulf %32, %31 : vector<8x512xf32>
    %34 = arith.maximumf %31, %33 : vector<8x512xf32>
    %c0_21 = arith.constant 0 : index
    %c0_22 = arith.constant 0 : index
    %35 = vector.load %arg9[%c0_21, %c0_22] : memref<1x512xf32, #tpu.memory_space<vmem>>, vector<1x512xf32>
    %36 = vector.broadcast %35 : vector<1x512xf32> to vector<8x512xf32>
    %37 = arith.mulf %34, %36 : vector<8x512xf32>
    %cst_23 = arith.constant dense<0.000000e+00> : vector<8xf32>
    %38 = vector.multi_reduction <add>, %37, %cst_23 [1] : vector<8x512xf32> to vector<8xf32>
    %39 = vector.shape_cast %38 : vector<8xf32> to vector<8x1xf32>
    %c0_24 = arith.constant 0 : index
    %c0_25 = arith.constant 0 : index
    %40 = vector.load %arg10[%c0_24, %c0_25] : memref<1x1xf32, #tpu.memory_space<vmem>>, vector<1x1xf32>
    %41 = vector.broadcast %40 : vector<1x1xf32> to vector<8x1xf32>
    %42 = arith.addf %39, %41 : vector<8x1xf32>
    %43 = arith.negf %42 : vector<8x1xf32>
    %44 = math.exp %43 : vector<8x1xf32>
    %cst_26 = arith.constant 1.000000e+00 : f32
    %45 = vector.broadcast %cst_26 : f32 to vector<8x1xf32>
    %46 = arith.addf %45, %44 : vector<8x1xf32>
    %47 = arith.divf %45, %46 : vector<8x1xf32>
    %c0_27 = arith.constant 0 : index
    %c0_28 = arith.constant 0 : index
    %48 = vector.load %arg11[%c0_27, %c0_28] : memref<8x1xf32, #tpu.memory_space<vmem>>, vector<8x1xf32>
    tpu.vector_store %arg11[%c0_27, %c0_28], %47 {strides = array<i32>} : memref<8x1xf32, #tpu.memory_space<vmem>>, vector<8x1xf32>,
    return
  }
  func.func @transform_0(%arg0: i32) -> (i32, i32) {
    %c0_i32 = arith.constant 0 : i32
    %c0_i32_0 = arith.constant 0 : i32
    return %arg0, %c0_i32 : i32, i32
  }
  func.func @transform_1(%arg0: i32) -> (i32, i32) {
    %c0_i32 = arith.constant 0 : i32
    %c0_i32_0 = arith.constant 0 : i32
    return %arg0, %c0_i32 : i32, i32
  }
  func.func @transform_2(%arg0: i32) -> (i32, i32) {
    %c0_i32 = arith.constant 0 : i32
    %c0_i32_0 = arith.constant 0 : i32
    %c0_i32_1 = arith.constant 0 : i32
    return %c0_i32, %c0_i32_0 : i32, i32
  }
  func.func @transform_3(%arg0: i32) -> (i32, i32) {
    %c0_i32 = arith.constant 0 : i32
    %c0_i32_0 = arith.constant 0 : i32
    %c0_i32_1 = arith.constant 0 : i32
    return %c0_i32, %c0_i32_0 : i32, i32
  }
  func.func @transform_4(%arg0: i32) -> (i32, i32) {
    %c0_i32 = arith.constant 0 : i32
    %c0_i32_0 = arith.constant 0 : i32
    %c0_i32_1 = arith.constant 0 : i32
    return %c0_i32, %c0_i32_0 : i32, i32
  }
  func.func @transform_5(%arg0: i32) -> (i32, i32) {
    %c0_i32 = arith.constant 0 : i32
    %c0_i32_0 = arith.constant 0 : i32
    %c0_i32_1 = arith.constant 0 : i32
    return %c0_i32, %c0_i32_0 : i32, i32
  }
  func.func @transform_6(%arg0: i32) -> (i32, i32) {
    %c0_i32 = arith.constant 0 : i32
    %c0_i32_0 = arith.constant 0 : i32
    %c0_i32_1 = arith.constant 0 : i32
    return %c0_i32, %c0_i32_0 : i32, i32
  }
  func.func @transform_7(%arg0: i32) -> (i32, i32) {
    %c0_i32 = arith.constant 0 : i32
    %c0_i32_0 = arith.constant 0 : i32
    %c0_i32_1 = arith.constant 0 : i32
    return %c0_i32, %c0_i32_0 : i32, i32
  }
  func.func @transform_8(%arg0: i32) -> (i32, i32) {
    %c0_i32 = arith.constant 0 : i32
    %c0_i32_0 = arith.constant 0 : i32
    %c0_i32_1 = arith.constant 0 : i32
    return %c0_i32, %c0_i32_0 : i32, i32
  }
  func.func @transform_9(%arg0: i32) -> (i32, i32) {
    %c0_i32 = arith.constant 0 : i32
    %c0_i32_0 = arith.constant 0 : i32
    %c0_i32_1 = arith.constant 0 : i32
    return %c0_i32, %c0_i32_0 : i32, i32
  }
  func.func @transform_10(%arg0: i32) -> (i32, i32) {
    %c0_i32 = arith.constant 0 : i32
    %c0_i32_0 = arith.constant 0 : i32
    return %arg0, %c0_i32 : i32, i32
  }
}

</mosaic_0001>

<bundles_post_ra>
// kernel: dis_forward.1
= control target key start
LH: loop header
LB: loop body
LE: loop exit
PB: predicated region body
PF: predicated region fallthrough
CT: control target
= control target key end

     0   :  { %s3394_s0 = inlined_call_operand.vmem [shape: f32[8,32], index: 0, kind: input, shape index: {}]   ;;  %s3395_s1 = inlined_call_operand.vmem [shape: s32[8,1], index: 1, kind: input, shape index: {}]   ;;  %s3396_s2 = inlined_call_operand.vmem [shape: bf16[8,512], index: 2, kind: input, shape index: {}]   ;;  %s3397_s3 = inlined_call_operand.hbm [shape: bf16[32,512], index: 3, kind: input, shape index: {}]   ;;  %s3398_s4 = inlined_call_operand.hbm [shape: bf16[512,512], index: 4, kind: input, shape index: {}]   ;;  %s3399_s5 = inlined_call_operand.hbm [shape: f32[1,512], index: 5, kind: input, shape index: {}]   ;;  %s3400_s6 = inlined_call_operand.hbm [shape: bf16[512,512], index: 6, kind: input, shape index: {}]   ;;  %s3401_s7 = inlined_call_operand.hbm [shape: f32[1,512], index: 7, kind: input, shape index: {}]   ;;  %s3402_s8 = inlined_call_operand.vmem [shape: f32[1,512], index: 8, kind: input, shape index: {}]   ;;  %s3403_s9 = inlined_call_operand.<no memory space> [shape: f32[1,1], index: 9, kind: input, shape index: {}]   ;;  %s3404_s10 = inlined_call_operand.vmem [shape: f32[8,1], index: 10, kind: output, shape index: {}]  }
   0x1   :  { %v15_v0 = vstv %s3403_s9 }
   0x2   :  { %16 = vst [vmem:[#allocation2] sm:$0x1] %v15_v0 }
   0x3   :  { %17 = vsyncpa [#allocation4], 0 }
   0x4   :  { %18 = vsyncpa [#allocation6], 0 }
   0x5   :  { %19 = vsyncpa [#allocation9], 0  ;;  %s3192_s15 = smov [#allocation5]   ;;  %s3193_s17 = smov [#allocation8]  }
   0x6   :  { %s43_s16 = sshll.u32 %s3192_s15, 4  ;;  %s65_s18 = sshll.u32 %s3193_s17, 4  ;;  %s44_s16 = int_to_ptr.vmem [resolvable:$true] %s43_s16  ;;  %s3259_s18 = int_to_ptr.vmem [resolvable:$true] %s65_s18 }
   0x7   :  { %s3076_s21 = scalar_lea.hbm %s3398_s4, 16384 }
   0x8   :  { %p3077_p0 = scmp.ne.s32.totalorder %s3398_s4, %s3076_s21  ;;  %p3080_p1 = scmp.lt.u32.totalorder %s3076_s21, %s3398_s4 }
   0xa   :  { %p3082_p2 = pnand %p3080_p1, %p3077_p0 }
   0xc   :  { %3085 = shalt.err (!%p3082_p2)
}
   0xd   :  { %s3086_s25 = scalar_lea.vmem %s44_s16, 16384  ;;  %p3091_p4 = scmp.lt.s32.totalorder %s44_s16, %s44_s16 }
   0xe   :  { %p3087_p3 = scmp.ne.s32.totalorder %s44_s16, %s3086_s25  ;;  %p3092_p5 = scmp.lt.s32.totalorder %s3086_s25, %s3086_s25 }
  0x10   :  { %p3093_p6 = por %p3092_p5, %p3091_p4 }
  0x12   :  { %p3094_p7 = pnand %p3093_p6, %p3087_p3 }
  0x14   :  { %3097 = shalt.err (!%p3094_p7)
}
  0x15   :  { %s3194_s26 = smov 256   ;;  %s3195_s27 = smov 16  }
  0x16   :  { %49 = dma.hbm_to_vmem [thread:$0]  %s3398_s4, 16384, %s44_s16, [#allocation6], %s3194_s26, %s3194_s26, %s3195_s27  }
  0x17   :  { %s3098_s12 = scalar_lea.hbm %s3400_s6, 16384 }
  0x18   :  { %p3099_p8 = scmp.ne.s32.totalorder %s3400_s6, %s3098_s12  ;;  %p3102_p9 = scmp.lt.u32.totalorder %s3098_s12, %s3400_s6 }
  0x1a   :  { %p3104_p10 = pnand %p3102_p9, %p3099_p8 }
  0x1c   :  { %3107 = shalt.err (!%p3104_p10)
}
  0x1d   :  { %s3108_s19 = scalar_lea.vmem %s3259_s18, 16384  ;;  %p3113_p12 = scmp.lt.s32.totalorder %s3259_s18, %s3259_s18 }
  0x1e   :  { %p3109_p11 = scmp.ne.s32.totalorder %s3259_s18, %s3108_s19  ;;  %p3114_p13 = scmp.lt.s32.totalorder %s3108_s19, %s3108_s19 }
  0x20   :  { %p3115_p0 = por %p3114_p13, %p3113_p12 }
  0x22   :  { %p3116_p1 = pnand %p3115_p0, %p3109_p11 }
  0x24   :  { %3119 = shalt.err (!%p3116_p1)
}
  0x25   :  { %71 = dma.hbm_to_vmem [thread:$0]  %s3400_s6, 16384, %s3259_s18, [#allocation9], %s3194_s26, %s3194_s26, %s3195_s27  }
  0x26   :  { %s3196_s20 = smov [#allocation3]   ;;  %s3197_s22 = smov [#allocation7]  }
  0x27   :  { %s31_s21 = sshll.u32 %s3196_s20, 4  ;;  %s56_s23 = sshll.u32 %s3197_s22, 4  ;;  %s32_s21 = int_to_ptr.vmem [resolvable:$true] %s31_s21  ;;  %s57_s23 = int_to_ptr.vmem [resolvable:$true] %s56_s23 }
  0x28   :  { %s3120_s25 = scalar_lea.hbm %s3397_s3, 1024 }
  0x29   :  { %p3121_p2 = scmp.ne.s32.totalorder %s3397_s3, %s3120_s25  ;;  %p3124_p3 = scmp.lt.u32.totalorder %s3120_s25, %s3397_s3 }
  0x2b   :  { %p3126_p4 = pnand %p3124_p3, %p3121_p2 }
  0x2d   :  { %3129 = shalt.err (!%p3126_p4)
}
  0x2e   :  { %s3130_s6 = scalar_lea.vmem %s32_s21, 1024  ;;  %p3135_p6 = scmp.lt.s32.totalorder %s32_s21, %s32_s21 }
  0x2f   :  { %p3131_p5 = scmp.ne.s32.totalorder %s32_s21, %s3130_s6  ;;  %p3136_p7 = scmp.lt.s32.totalorder %s3130_s6, %s3130_s6 }
  0x31   :  { %p3137_p8 = por %p3136_p7, %p3135_p6 }
  0x33   :  { %p3138_p9 = pnand %p3137_p8, %p3131_p5 }
  0x35   :  { %3141 = shalt.err (!%p3138_p9)
}
  0x36   :  { %37 = dma.hbm_to_vmem [thread:$0]  %s3397_s3, 1024, %s32_s21, [#allocation4], %s3194_s26, %s3194_s26, %s3195_s27  }
  0x37   :  { %s3142_s15 = scalar_lea.hbm %s3399_s5, 64 }
  0x38   :  { %p3143_p10 = scmp.ne.s32.totalorder %s3399_s5, %s3142_s15  ;;  %p3146_p11 = scmp.lt.u32.totalorder %s3142_s15, %s3399_s5 }
  0x3a   :  { %p3148_p12 = pnand %p3146_p11, %p3143_p10 }
  0x3c   :  { %3151 = shalt.err (!%p3148_p12)
}
  0x3d   :  { %s3152_s20 = scalar_lea.vmem %s57_s23, 64  ;;  %p3157_p0 = scmp.lt.s32.totalorder %s57_s23, %s57_s23 }
  0x3e   :  { %p3153_p13 = scmp.ne.s32.totalorder %s57_s23, %s3152_s20  ;;  %p3158_p1 = scmp.lt.s32.totalorder %s3152_s20, %s3152_s20 }
  0x40   :  { %p3159_p2 = por %p3158_p1, %p3157_p0 }
  0x42   :  { %p3160_p3 = pnand %p3159_p2, %p3153_p13 }
  0x44   :  { %3163 = shalt.err (!%p3160_p3)
}
  0x45   :  { %59 = dma.hbm_to_vmem [thread:$0]  %s3399_s5, 64, %s57_s23, [#allocation6]  }
  0x46   :  { %s3198_s27 = smov [#allocation10]   ;;  %s3164_s24 = scalar_lea.hbm %s3401_s7, 64 }
  0x47   :  { %s78_s21 = sshll.u32 %s3198_s27, 4  ;;  %p3165_p4 = scmp.ne.s32.totalorder %s3401_s7, %s3164_s24  ;;  %s79_s21 = int_to_ptr.vmem [resolvable:$true] %s78_s21 }
  0x48   :  { %p3168_p5 = scmp.lt.u32.totalorder %s3164_s24, %s3401_s7 }
  0x4a   :  { %p3170_p6 = pnand %p3168_p5, %p3165_p4 }
  0x4c   :  { %3173 = shalt.err (!%p3170_p6)
}
  0x4d   :  { %s3174_s11 = scalar_lea.vmem %s79_s21, 64  ;;  %p3179_p8 = scmp.lt.s32.totalorder %s79_s21, %s79_s21 }
  0x4e   :  { %p3175_p7 = scmp.ne.s32.totalorder %s79_s21, %s3174_s11  ;;  %p3180_p9 = scmp.lt.s32.totalorder %s3174_s11, %s3174_s11 }
  0x50   :  { %p3181_p10 = por %p3180_p9, %p3179_p8 }
  0x52   :  { %p3182_p11 = pnand %p3181_p10, %p3175_p7 }
  0x54   :  { %3185 = shalt.err (!%p3182_p11)
}
  0x55   :  { %81 = dma.hbm_to_vmem [thread:$0]  %s3401_s7, 64, %s79_s21, [#allocation9]  }
  0x56   :  { %3186 = dma.done.wait [#allocation4], 1024  }
  0x57   :  { %3187 = vsyncadd [#allocation4], 4294966272 }
  0x58   :  { %3188 = dma.done.wait [#allocation6], 16448  }
  0x59   :  { %3189 = vsyncadd [#allocation6], 4294950848 }
  0x5a   :  { %3190 = dma.done.wait [#allocation9], 16448  }
  0x5b   :  { %3191 = vsyncadd [#allocation9], 4294950848  ;;  %v3199_v1 = vmov 0   ;;  %v112_v2 = vld [vmem:[%s3395_s1] sm:$0xff]  ;;  %vm138_vm0 = vcmask 1043456   ;;  %v123_v4 = vld [vmem:[%s3396_s2 + $0x8] sm:$0xff]  ;;  %v113_v13 = vlaneseq }
  0x5c   :  { %2671 = vset.pattern.permute.xlu0 %v3199_v1  ;;  %183 = vmatprep.mubr.bf16.mxu0 %v3199_v1  ;;  %v122_v3 = vld [vmem:[%s3396_s2] sm:$0xff]  ;;  %v2357_v7 = vcombine.high %v123_v4, %v123_v4  ;;  %v2356_v8 = vcombine.low %v123_v4, %v123_v4  ;;  %v3200_v16 = vmov 0.0   ;;  %vm134_vm2 = vcmask 64512   ;;  %v2679_v19 = vld [vmem:[#allocation3 + $0x8] ss:$16 sps:$4 sm:$0xff]  }
  0x5d   :  { %224 = vmatprep.mubr.bf16.mxu1 %v3199_v1  ;;  %116 = vperm.xlu0 %2671, %v112_v2   ;;  %v2355_v5 = vcombine.high %v122_v3, %v122_v3  ;;  %v2354_v6 = vcombine.low %v122_v3, %v122_v3  ;;  %v2678_v11 = vld [vmem:[#allocation3 + $0x4] ss:$16 sps:$4 sm:$0xff]   ;;  %v2681_v12 = vld [vmem:[#allocation3 + $0xc] ss:$16 sps:$4 sm:$0xff]   ;;  %v114_v14 = vand.u32 127, %v113_v13  ;;  %vm273_vm3 = vcmask 261120  }
  0x5e   :  { %2360 = vmatprep.subr.msk.bf16.mxu1 %vm138_vm0, %v2357_v7  ;;  %v146_v10 = vsel %vm138_vm0, %v2356_v8, 0  ;;  %v2676_v18 = vld [vmem:[#allocation3] ss:$16 sps:$4 sm:$0xff]   ;;  %v2684_v21 = vld [vmem:[#allocation3 + $0x24] ss:$16 sps:$4 sm:$0xff]   ;;  %vm2344_vm4 = vcmask 7168  }
  0x5f   :  { %2358 = vmatprep.subr.msk.bf16.mxu0 %vm138_vm0, %v2355_v5  ;;  %v140_v9 = vsel %vm138_vm0, %v2354_v6, 0  ;;  %193 = vmatpush1.bf16.msra.mxu1 %v146_v10  ;;  %v2687_v22 = vld [vmem:[#allocation3 + $0x2c] ss:$16 sps:$4 sm:$0xff]   ;;  %v2682_v23 = vld [vmem:[#allocation3 + $0x20] ss:$16 sps:$4 sm:$0xff]  }
  0x60   :  { %152 = vmatpush1.bf16.msra.mxu0 %v140_v9  ;;  %318 = vmatprep.subr.bf16.mxu1 %v2681_v12  ;;  %v2685_v24 = vld [vmem:[#allocation3 + $0x28] ss:$16 sps:$4 sm:$0xff]   ;;  %v2690_v25 = vld [vmem:[#allocation5 + $0x4] ss:$16 sps:$4 sm:$0xff]   ;;  %v2693_v26 = vld [vmem:[#allocation5 + $0xc] ss:$16 sps:$4 sm:$0xff]  }
  0x61   :  { %277 = vmatprep.subr.bf16.mxu0 %v2678_v11  ;;  %v102_v27 = vld [vmem:[%s3394_s0] sm:$0xff]  ;;  %v2691_v30 = vld [vmem:[#allocation5 + $0x8] ss:$16 sps:$4 sm:$0xff]  }
  0x62   :  { %v103_v28 = vpack.c.bf16 %v102_v27, %v102_v27  ;;  %v2688_v29 = vld [vmem:[#allocation5] ss:$16 sps:$4 sm:$0xff]   ;;  %v2696_v31 = vld [vmem:[#allocation5 + $0x24] ss:$16 sps:$4 sm:$0xff]   ;;  %v2699_v32 = vld [vmem:[#allocation5 + $0x2c] ss:$16 sps:$4 sm:$0xff]  }
  0x63   :  { %v2694_v33 = vld [vmem:[#allocation5 + $0x20] ss:$16 sps:$4 sm:$0xff]   ;;  %v2697_v34 = vld [vmem:[#allocation5 + $0x28] ss:$16 sps:$4 sm:$0xff]   ;;  %v2702_v35 = vld [vmem:[#allocation5 + $0x44] ss:$16 sps:$4 sm:$0xff]  }
  0x64   :  { %v2705_v36 = vld [vmem:[#allocation5 + $0x4c] ss:$16 sps:$4 sm:$0xff]   ;;  %v2700_v37 = vld [vmem:[#allocation5 + $0x40] ss:$16 sps:$4 sm:$0xff]   ;;  %v2703_v38 = vld [vmem:[#allocation5 + $0x48] ss:$16 sps:$4 sm:$0xff]  }
  0x65   :  { %v2708_v39 = vld [vmem:[#allocation5 + $0x64] ss:$16 sps:$4 sm:$0xff]   ;;  %v2711_v40 = vld [vmem:[#allocation5 + $0x6c] ss:$16 sps:$4 sm:$0xff]   ;;  %v2706_v41 = vld [vmem:[#allocation5 + $0x60] ss:$16 sps:$4 sm:$0xff]  }
  0x66   :  { %v2709_v42 = vld [vmem:[#allocation5 + $0x68] ss:$16 sps:$4 sm:$0xff]   ;;  %v2714_v43 = vld [vmem:[#allocation5 + $0x84] ss:$16 sps:$4 sm:$0xff]   ;;  %v2717_v44 = vld [vmem:[#allocation5 + $0x8c] ss:$16 sps:$4 sm:$0xff]  }
  0x67   :  { %v2712_v45 = vld [vmem:[#allocation5 + $0x80] ss:$16 sps:$4 sm:$0xff]   ;;  %v2715_v46 = vld [vmem:[#allocation5 + $0x88] ss:$16 sps:$4 sm:$0xff]   ;;  %v2720_v47 = vld [vmem:[#allocation5 + $0xa4] ss:$16 sps:$4 sm:$0xff]  }
  0x68   :  { %v2723_v48 = vld [vmem:[#allocation5 + $0xac] ss:$16 sps:$4 sm:$0xff]   ;;  %v2718_v49 = vld [vmem:[#allocation5 + $0xa0] ss:$16 sps:$4 sm:$0xff]   ;;  %v2721_v50 = vld [vmem:[#allocation5 + $0xa8] ss:$16 sps:$4 sm:$0xff]  }
  0x69   :  { %v2726_v51 = vld [vmem:[#allocation5 + $0xc4] ss:$16 sps:$4 sm:$0xff]   ;;  %v2729_v52 = vld [vmem:[#allocation5 + $0xcc] ss:$16 sps:$4 sm:$0xff]   ;;  %v2724_v53 = vld [vmem:[#allocation5 + $0xc0] ss:$16 sps:$4 sm:$0xff]  }
  0x6a   :  { %v2727_v54 = vld [vmem:[#allocation5 + $0xc8] ss:$16 sps:$4 sm:$0xff]   ;;  %v2732_v55 = vld [vmem:[#allocation5 + $0xe4] ss:$16 sps:$4 sm:$0xff]   ;;  %v2735_v56 = vld [vmem:[#allocation5 + $0xec] ss:$16 sps:$4 sm:$0xff]  }
  0x6b   :  { %v2730_v57 = vld [vmem:[#allocation5 + $0xe0] ss:$16 sps:$4 sm:$0xff]   ;;  %v2733_v58 = vld [vmem:[#allocation5 + $0xe8] ss:$16 sps:$4 sm:$0xff]   ;;  %v2738_v59 = vld [vmem:[#allocation5 + $0x104] ss:$16 sps:$4 sm:$0xff]  }
  0x6c   :  { %v2741_v60 = vld [vmem:[#allocation5 + $0x10c] ss:$16 sps:$4 sm:$0xff]   ;;  %v2736_v61 = vld [vmem:[#allocation5 + $0x100] ss:$16 sps:$4 sm:$0xff]   ;;  %v2739_v62 = vld [vmem:[#allocation5 + $0x108] ss:$16 sps:$4 sm:$0xff]  }
  0x6d   :  { %v2744_v63 = vld [vmem:[#allocation5 + $0x124] ss:$16 sps:$4 sm:$0xff]   ;;  %v2747_v0 = vld [vmem:[#allocation5 + $0x12c] ss:$16 sps:$4 sm:$0xff]   ;;  %v2745_v2 = vld [vmem:[#allocation5 + $0x128] ss:$16 sps:$4 sm:$0xff]  }
  0x6e   :  { %v2750_v3 = vld [vmem:[#allocation5 + $0x144] ss:$16 sps:$4 sm:$0xff]   ;;  %v2753_v4 = vld [vmem:[#allocation5 + $0x14c] ss:$16 sps:$4 sm:$0xff]   ;;  %v2748_v5 = vld [vmem:[#allocation5 + $0x140] ss:$16 sps:$4 sm:$0xff]  }
  0x6f   :  { %v2751_v6 = vld [vmem:[#allocation5 + $0x148] ss:$16 sps:$4 sm:$0xff]   ;;  %v2756_v7 = vld [vmem:[#allocation5 + $0x164] ss:$16 sps:$4 sm:$0xff]   ;;  %v2759_v8 = vld [vmem:[#allocation5 + $0x16c] ss:$16 sps:$4 sm:$0xff]  }
  0x70   :  { %v2754_v9 = vld [vmem:[#allocation5 + $0x160] ss:$16 sps:$4 sm:$0xff]   ;;  %v2757_v10 = vld [vmem:[#allocation5 + $0x168] ss:$16 sps:$4 sm:$0xff]   ;;  %v2762_v11 = vld [vmem:[#allocation5 + $0x184] ss:$16 sps:$4 sm:$0xff]  }
  0x71   :  { %v2765_v12 = vld [vmem:[#allocation5 + $0x18c] ss:$16 sps:$4 sm:$0xff]   ;;  %v2781_v27 = vld [vmem:[#allocation5 + $0x1e8] ss:$16 sps:$4 sm:$0xff]  }
  0xdc   :  { %v117_v15 = vpop.permute.xlu0 %116 }
  0xdd   :  { %vm118_vm1 = vcmp.eq.s32.totalorder %v114_v14, %v117_v15  ;;  %v2760_v14 = vld [vmem:[#allocation5 + $0x180] ss:$16 sps:$4 sm:$0xff]   ;;  %v2763_v15 = vld [vmem:[#allocation5 + $0x188] ss:$16 sps:$4 sm:$0xff]  }
  0xde   :  { %v2353_v17 = vsel %vm118_vm1, 1.0, %v3200_v16  ;;  %v2768_v16 = vld [vmem:[#allocation5 + $0x1a4] ss:$16 sps:$4 sm:$0xff]  }
  0xdf   :  { %v121_v20 = vpack.c.bf16 %v2353_v17, %v2353_v17  ;;  %v2771_v17 = vld [vmem:[#allocation5 + $0x1ac] ss:$16 sps:$4 sm:$0xff]  }
  0xe1   :  { %2359 = vmatmul.mubr.msk.bf16.vlgmr.msra.gmra.mrb[0].mxu0 %vm134_vm2, %v121_v20  ;;  %2361 = vmatmul.mubr.msk.bf16.vlgmr.msra.gmra.mrb[0].mxu1 %vm134_vm2, %v121_v20  ;;  %v2774_v20 = vld [vmem:[#allocation5 + $0x1c4] ss:$16 sps:$4 sm:$0xff]  }
  0xe2   :  { %278 = vmatpush1.bf16.msra.mxu0 %v2676_v18  ;;  %319 = vmatpush1.bf16.msra.mxu1 %v2679_v19  ;;  %v2766_v18 = vld [vmem:[#allocation5 + $0x1a0] ss:$16 sps:$4 sm:$0xff]   ;;  %v2769_v19 = vld [vmem:[#allocation5 + $0x1a8] ss:$16 sps:$4 sm:$0xff]  }
  0xe3   :  { %279 = vmatprep.subr.bf16.mxu0 %v2684_v21  ;;  %320 = vmatprep.subr.bf16.mxu1 %v2687_v22  ;;  %v2777_v21 = vld [vmem:[#allocation5 + $0x1cc] ss:$16 sps:$4 sm:$0xff]   ;;  %v2772_v22 = vld [vmem:[#allocation5 + $0x1c0] ss:$16 sps:$4 sm:$0xff]  }
  0xe4   :  { %309 = vmatprep.mubr.bf16.mxu0 %v3199_v1  ;;  %350 = vmatprep.mubr.bf16.mxu1 %v3199_v1  ;;  %v2742_v1 = vld [vmem:[#allocation5 + $0x120] ss:$16 sps:$4 sm:$0xff]  }
  0xe6   :  { %280 = vmatpush1.bf16.msra.mxu0 %v2682_v23  ;;  %321 = vmatpush1.bf16.msra.mxu1 %v2685_v24  ;;  %v2775_v23 = vld [vmem:[#allocation5 + $0x1c8] ss:$16 sps:$4 sm:$0xff]   ;;  %v2780_v24 = vld [vmem:[#allocation5 + $0x1e4] ss:$16 sps:$4 sm:$0xff]  }
  0xe7   :  { %1161 = vmatprep.subr.bf16.mxu0 %v2690_v25  ;;  %1243 = vmatprep.subr.bf16.mxu1 %v2693_v26  ;;  %v2783_v25 = vld [vmem:[#allocation5 + $0x1ec] ss:$16 sps:$4 sm:$0xff]   ;;  %v2778_v26 = vld [vmem:[#allocation5 + $0x1e0] ss:$16 sps:$4 sm:$0xff]  }
  0xed   :  { %2370 = vmatmul.mubr.msk.bf16.vlgmr.msra.gmra.mrb[0].mxu0 %vm273_vm3, %v103_v28  ;;  %2371 = vmatmul.mubr.msk.bf16.vlgmr.msra.gmra.mrb[0].mxu1 %vm273_vm3, %v103_v28  ;;  %v2786_v28 = vld [vmem:[#allocation5 + $0x204] ss:$16 sps:$4 sm:$0xff]  }
  0xee   :  { %1162 = vmatpush1.bf16.msra.mxu0 %v2688_v29  ;;  %1244 = vmatpush1.bf16.msra.mxu1 %v2691_v30  ;;  %v2789_v29 = vld [vmem:[#allocation5 + $0x20c] ss:$16 sps:$4 sm:$0xff]  }
  0xef   :  { %1163 = vmatprep.subr.bf16.mxu0 %v2696_v31  ;;  %1245 = vmatprep.subr.bf16.mxu1 %v2699_v32 }
  0xf2   :  { %1164 = vmatpush1.bf16.msra.mxu0 %v2694_v33  ;;  %1246 = vmatpush1.bf16.msra.mxu1 %v2697_v34 }
  0xf3   :  { %1165 = vmatprep.subr.bf16.mxu0 %v2702_v35  ;;  %1247 = vmatprep.subr.bf16.mxu1 %v2705_v36 }
  0xf6   :  { %1166 = vmatpush1.bf16.msra.mxu0 %v2700_v37  ;;  %1248 = vmatpush1.bf16.msra.mxu1 %v2703_v38 }
  0xf7   :  { %1167 = vmatprep.subr.bf16.mxu0 %v2708_v39  ;;  %1249 = vmatprep.subr.bf16.mxu1 %v2711_v40 }
  0xfa   :  { %1168 = vmatpush1.bf16.msra.mxu0 %v2706_v41  ;;  %1250 = vmatpush1.bf16.msra.mxu1 %v2709_v42 }
  0xfb   :  { %1169 = vmatprep.subr.bf16.mxu0 %v2714_v43  ;;  %1251 = vmatprep.subr.bf16.mxu1 %v2717_v44 }
  0xfe   :  { %1170 = vmatpush1.bf16.msra.mxu0 %v2712_v45  ;;  %1252 = vmatpush1.bf16.msra.mxu1 %v2715_v46  ;;  %v2784_v45 = vld [vmem:[#allocation5 + $0x200] ss:$16 sps:$4 sm:$0xff]   ;;  %v2787_v46 = vld [vmem:[#allocation5 + $0x208] ss:$16 sps:$4 sm:$0xff]  }
  0xff   :  { %1171 = vmatprep.subr.bf16.mxu0 %v2720_v47  ;;  %1253 = vmatprep.subr.bf16.mxu1 %v2723_v48  ;;  %v2792_v48 = vld [vmem:[#allocation5 + $0x224] ss:$16 sps:$4 sm:$0xff]  }
 0x102   :  { %1172 = vmatpush1.bf16.msra.mxu0 %v2718_v49  ;;  %1254 = vmatpush1.bf16.msra.mxu1 %v2721_v50  ;;  %v2795_v49 = vld [vmem:[#allocation5 + $0x22c] ss:$16 sps:$4 sm:$0xff]  }
 0x103   :  { %1173 = vmatprep.subr.bf16.mxu0 %v2726_v51  ;;  %1255 = vmatprep.subr.bf16.mxu1 %v2729_v52  ;;  %v2790_v51 = vld [vmem:[#allocation5 + $0x220] ss:$16 sps:$4 sm:$0xff]   ;;  %v2793_v52 = vld [vmem:[#allocation5 + $0x228] ss:$16 sps:$4 sm:$0xff]  }
 0x106   :  { %1174 = vmatpush1.bf16.msra.mxu0 %v2724_v53  ;;  %1256 = vmatpush1.bf16.msra.mxu1 %v2727_v54  ;;  %v2798_v53 = vld [vmem:[#allocation5 + $0x244] ss:$16 sps:$4 sm:$0xff]   ;;  %v2801_v54 = vld [vmem:[#allocation5 + $0x24c] ss:$16 sps:$4 sm:$0xff]  }
 0x107   :  { %1175 = vmatprep.subr.bf16.mxu0 %v2732_v55  ;;  %1257 = vmatprep.subr.bf16.mxu1 %v2735_v56  ;;  %v2796_v55 = vld [vmem:[#allocation5 + $0x240] ss:$16 sps:$4 sm:$0xff]   ;;  %v2799_v56 = vld [vmem:[#allocation5 + $0x248] ss:$16 sps:$4 sm:$0xff]  }
 0x10a   :  { %1176 = vmatpush1.bf16.msra.mxu0 %v2730_v57  ;;  %1258 = vmatpush1.bf16.msra.mxu1 %v2733_v58  ;;  %v2804_v57 = vld [vmem:[#allocation5 + $0x264] ss:$16 sps:$4 sm:$0xff]   ;;  %v2807_v58 = vld [vmem:[#allocation5 + $0x26c] ss:$16 sps:$4 sm:$0xff]  }
 0x10b   :  { %1177 = vmatprep.subr.bf16.mxu0 %v2738_v59  ;;  %1259 = vmatprep.subr.bf16.mxu1 %v2741_v60  ;;  %v2802_v59 = vld [vmem:[#allocation5 + $0x260] ss:$16 sps:$4 sm:$0xff]   ;;  %v2805_v60 = vld [vmem:[#allocation5 + $0x268] ss:$16 sps:$4 sm:$0xff]  }
 0x10e   :  { %1178 = vmatpush1.bf16.msra.mxu0 %v2736_v61  ;;  %1260 = vmatpush1.bf16.msra.mxu1 %v2739_v62  ;;  %v2810_v61 = vld [vmem:[#allocation5 + $0x284] ss:$16 sps:$4 sm:$0xff]   ;;  %v2813_v62 = vld [vmem:[#allocation5 + $0x28c] ss:$16 sps:$4 sm:$0xff]  }
 0x10f   :  { %1179 = vmatprep.subr.bf16.mxu0 %v2744_v63  ;;  %1261 = vmatprep.subr.bf16.mxu1 %v2747_v0  ;;  %v2808_v63 = vld [vmem:[#allocation5 + $0x280] ss:$16 sps:$4 sm:$0xff]   ;;  %v2811_v0 = vld [vmem:[#allocation5 + $0x288] ss:$16 sps:$4 sm:$0xff]  }
 0x112   :  { %1180 = vmatpush1.bf16.msra.mxu0 %v2742_v1  ;;  %1262 = vmatpush1.bf16.msra.mxu1 %v2745_v2  ;;  %v2816_v1 = vld [vmem:[#allocation5 + $0x2a4] ss:$16 sps:$4 sm:$0xff]   ;;  %v2819_v2 = vld [vmem:[#allocation5 + $0x2ac] ss:$16 sps:$4 sm:$0xff]  }
 0x113   :  { %1181 = vmatprep.subr.bf16.mxu0 %v2750_v3  ;;  %1263 = vmatprep.subr.bf16.mxu1 %v2753_v4  ;;  %v2814_v3 = vld [vmem:[#allocation5 + $0x2a0] ss:$16 sps:$4 sm:$0xff]   ;;  %v2817_v4 = vld [vmem:[#allocation5 + $0x2a8] ss:$16 sps:$4 sm:$0xff]  }
 0x116   :  { %1182 = vmatpush1.bf16.msra.mxu0 %v2748_v5  ;;  %1264 = vmatpush1.bf16.msra.mxu1 %v2751_v6  ;;  %v2822_v5 = vld [vmem:[#allocation5 + $0x2c4] ss:$16 sps:$4 sm:$0xff]   ;;  %v2825_v6 = vld [vmem:[#allocation5 + $0x2cc] ss:$16 sps:$4 sm:$0xff]  }
 0x117   :  { %1183 = vmatprep.subr.bf16.mxu0 %v2756_v7  ;;  %1265 = vmatprep.subr.bf16.mxu1 %v2759_v8  ;;  %v2820_v7 = vld [vmem:[#allocation5 + $0x2c0] ss:$16 sps:$4 sm:$0xff]   ;;  %v2823_v8 = vld [vmem:[#allocation5 + $0x2c8] ss:$16 sps:$4 sm:$0xff]  }
 0x11a   :  { %1184 = vmatpush1.bf16.msra.mxu0 %v2754_v9  ;;  %1266 = vmatpush1.bf16.msra.mxu1 %v2757_v10  ;;  %v2828_v9 = vld [vmem:[#allocation5 + $0x2e4] ss:$16 sps:$4 sm:$0xff]   ;;  %v2831_v10 = vld [vmem:[#allocation5 + $0x2ec] ss:$16 sps:$4 sm:$0xff]  }
 0x11b   :  { %1185 = vmatprep.subr.bf16.mxu0 %v2762_v11  ;;  %1267 = vmatprep.subr.bf16.mxu1 %v2765_v12  ;;  %v2826_v11 = vld [vmem:[#allocation5 + $0x2e0] ss:$16 sps:$4 sm:$0xff]   ;;  %v2829_v12 = vld [vmem:[#allocation5 + $0x2e8] ss:$16 sps:$4 sm:$0xff]  }
 0x11e   :  { %1186 = vmatpush1.bf16.msra.mxu0 %v2760_v14  ;;  %1268 = vmatpush1.bf16.msra.mxu1 %v2763_v15  ;;  %v2834_v14 = vld [vmem:[#allocation5 + $0x304] ss:$16 sps:$4 sm:$0xff]   ;;  %v2837_v15 = vld [vmem:[#allocation5 + $0x30c] ss:$16 sps:$4 sm:$0xff]  }
 0x11f   :  { %1187 = vmatprep.subr.bf16.mxu0 %v2768_v16  ;;  %1269 = vmatprep.subr.bf16.mxu1 %v2771_v17  ;;  %v2832_v16 = vld [vmem:[#allocation5 + $0x300] ss:$16 sps:$4 sm:$0xff]   ;;  %v2835_v17 = vld [vmem:[#allocation5 + $0x308] ss:$16 sps:$4 sm:$0xff]  }
 0x122   :  { %1188 = vmatpush1.bf16.msra.mxu0 %v2766_v18  ;;  %1270 = vmatpush1.bf16.msra.mxu1 %v2769_v19  ;;  %v2840_v18 = vld [vmem:[#allocation5 + $0x324] ss:$16 sps:$4 sm:$0xff]   ;;  %v2843_v19 = vld [vmem:[#allocation5 + $0x32c] ss:$16 sps:$4 sm:$0xff]  }
 0x123   :  { %1189 = vmatprep.subr.bf16.mxu0 %v2774_v20  ;;  %1271 = vmatprep.subr.bf16.mxu1 %v2777_v21  ;;  %v2838_v20 = vld [vmem:[#allocation5 + $0x320] ss:$16 sps:$4 sm:$0xff]   ;;  %v2841_v21 = vld [vmem:[#allocation5 + $0x328] ss:$16 sps:$4 sm:$0xff]  }
 0x126   :  { %1190 = vmatpush1.bf16.msra.mxu0 %v2772_v22  ;;  %1272 = vmatpush1.bf16.msra.mxu1 %v2775_v23  ;;  %v2846_v22 = vld [vmem:[#allocation5 + $0x344] ss:$16 sps:$4 sm:$0xff]   ;;  %v2849_v23 = vld [vmem:[#allocation5 + $0x34c] ss:$16 sps:$4 sm:$0xff]  }
 0x127   :  { %1191 = vmatprep.subr.bf16.mxu0 %v2780_v24  ;;  %1273 = vmatprep.subr.bf16.mxu1 %v2783_v25  ;;  %v2844_v24 = vld [vmem:[#allocation5 + $0x340] ss:$16 sps:$4 sm:$0xff]   ;;  %v2847_v25 = vld [vmem:[#allocation5 + $0x348] ss:$16 sps:$4 sm:$0xff]  }
 0x12a   :  { %1192 = vmatpush1.bf16.msra.mxu0 %v2778_v26  ;;  %1274 = vmatpush1.bf16.msra.mxu1 %v2781_v27  ;;  %v2852_v26 = vld [vmem:[#allocation5 + $0x364] ss:$16 sps:$4 sm:$0xff]   ;;  %v2855_v27 = vld [vmem:[#allocation5 + $0x36c] ss:$16 sps:$4 sm:$0xff]  }
 0x12b   :  { %1202 = vmatprep.subr.bf16.mxu0 %v2786_v28  ;;  %1284 = vmatprep.subr.bf16.mxu1 %v2789_v29  ;;  %v2850_v28 = vld [vmem:[#allocation5 + $0x360] ss:$16 sps:$4 sm:$0xff]   ;;  %v2853_v29 = vld [vmem:[#allocation5 + $0x368] ss:$16 sps:$4 sm:$0xff]  }
 0x1c0   :  { %v311_v30 = vpop.f32.mrb[0].mxu0  ;;  %v3348_v31 = vpop.f32.mrb[0].mxu1 }
 0x1c1   :  { %v359_v32 = vmul.f32 0.2, %v311_v30  ;;  %v313_v33 = vpop.f32.mrb[1].mxu0  ;;  %v354_v34 = vpop.f32.mrb[1].mxu1 }
 0x1c2   :  { %v360_v35 = vmul.f32 0.2, %v313_v33  ;;  %v362_v36 = vmul.f32 0.2, %v354_v34  ;;  %v315_v37 = vpop.f32.mrb[2].mxu0  ;;  %v356_v38 = vpop.f32.mrb[2].mxu1 }
 0x1c3   :  { %v363_v39 = vmax.f32 %v311_v30, %v359_v32  ;;  %v316_v40 = vpop.f32.mrb[3].mxu0  ;;  %v357_v41 = vpop.f32.mrb[3].mxu1  ;;  %v2858_v30 = vld [vmem:[#allocation5 + $0x384] ss:$16 sps:$4 sm:$0xff]   ;;  %v2861_v32 = vld [vmem:[#allocation5 + $0x38c] ss:$16 sps:$4 sm:$0xff]  }
 0x1c4   :  { %v364_v42 = vmax.f32 %v313_v33, %v360_v35  ;;  %v366_v43 = vmax.f32 %v354_v34, %v362_v36  ;;  %v2856_v33 = vld [vmem:[#allocation5 + $0x380] ss:$16 sps:$4 sm:$0xff]   ;;  %v2859_v34 = vld [vmem:[#allocation5 + $0x388] ss:$16 sps:$4 sm:$0xff]   ;;  %v2864_v35 = vld [vmem:[#allocation5 + $0x3a4] ss:$16 sps:$4 sm:$0xff]  }
 0x1c5   :  { %v367_v47 = vpack.c.bf16 %v363_v39, %v363_v39  ;;  %v2867_v36 = vld [vmem:[#allocation5 + $0x3ac] ss:$16 sps:$4 sm:$0xff]   ;;  %v2862_v37 = vld [vmem:[#allocation5 + $0x3a0] ss:$16 sps:$4 sm:$0xff]   ;;  %v2865_v38 = vld [vmem:[#allocation5 + $0x3a8] ss:$16 sps:$4 sm:$0xff]  }
 0x1c6   :  { %v368_v44 = vpack.c.bf16 %v364_v42, %v364_v42  ;;  %v370_v50 = vpack.c.bf16 %v366_v43, %v366_v43  ;;  %v2870_v39 = vld [vmem:[#allocation5 + $0x3c4] ss:$16 sps:$4 sm:$0xff]   ;;  %v2873_v40 = vld [vmem:[#allocation5 + $0x3cc] ss:$16 sps:$4 sm:$0xff]   ;;  %v2868_v41 = vld [vmem:[#allocation5 + $0x3c0] ss:$16 sps:$4 sm:$0xff]  }
 0x1c7   :  { %v2871_v42 = vld [vmem:[#allocation5 + $0x3c8] ss:$16 sps:$4 sm:$0xff]   ;;  %v361_v43 = vmul.f32 0.2, %v3348_v31 }
 0x1c8   :  { %1193 = vmatprep.mubr.bf16.mxu0 %v368_v44  ;;  %1275 = vmatprep.mubr.bf16.mxu1 %v368_v44  ;;  %v2876_v44 = vld [vmem:[#allocation5 + $0x3e4] ss:$16 sps:$4 sm:$0xff]  }
 0x1c9   :  { %1194 = vmatmul.mubr.bf16.vlgmr.msra.gmra.mrb[4].mxu0 %v367_v47  ;;  %1276 = vmatmul.mubr.bf16.vlgmr.msra.gmra.mrb[4].mxu1 %v367_v47  ;;  %v2877_v47 = vld [vmem:[#allocation5 + $0x3e8] ss:$16 sps:$4 sm:$0xff]  }
 0x1ca   :  { %1203 = vmatpush1.bf16.msra.mxu0 %v2784_v45  ;;  %1285 = vmatpush1.bf16.msra.mxu1 %v2787_v46  ;;  %v2879_v45 = vld [vmem:[#allocation5 + $0x3ec] ss:$16 sps:$4 sm:$0xff]   ;;  %v2874_v46 = vld [vmem:[#allocation5 + $0x3e0] ss:$16 sps:$4 sm:$0xff]  }
 0x1cb   :  { %1234 = vmatprep.mubr.bf16.mxu0 %v370_v50  ;;  %1316 = vmatprep.mubr.bf16.mxu1 %v370_v50  ;;  %v2885_v50 = vld [vmem:[#allocation8 + $0xc] ss:$16 sps:$4 sm:$0xff]  }
 0x1cc   :  { %1204 = vmatprep.subr.bf16.mxu0 %v2792_v48  ;;  %1286 = vmatprep.subr.bf16.mxu1 %v2795_v49  ;;  %v365_v48 = vmax.f32 %v3348_v31, %v361_v43  ;;  %v2882_v49 = vld [vmem:[#allocation8 + $0x4] ss:$16 sps:$4 sm:$0xff]  }
 0x1cd   :  { %v2894_v31 = vld [vmem:[#allocation8 + $0x44] ss:$16 sps:$4 sm:$0xff]  }
 0x1ce   :  { %1205 = vmatpush1.bf16.msra.mxu0 %v2790_v51  ;;  %1287 = vmatpush1.bf16.msra.mxu1 %v2793_v52  ;;  %v2880_v51 = vld [vmem:[#allocation8] ss:$16 sps:$4 sm:$0xff]   ;;  %v2883_v52 = vld [vmem:[#allocation8 + $0x8] ss:$16 sps:$4 sm:$0xff]   ;;  %v2966_v43 = vld [vmem:[#allocation8 + $0x1c4] ss:$16 sps:$4 sm:$0xff]  }
 0x1cf   :  { %1206 = vmatprep.subr.bf16.mxu0 %v2798_v53  ;;  %1288 = vmatprep.subr.bf16.mxu1 %v2801_v54  ;;  %v369_v53 = vpack.c.bf16 %v365_v48, %v365_v48  ;;  %v2888_v54 = vld [vmem:[#allocation8 + $0x24] ss:$16 sps:$4 sm:$0xff]   ;;  %v2975_v48 = vld [vmem:[#allocation8 + $0x1ec] ss:$16 sps:$4 sm:$0xff]  }
 0x1d2   :  { %1207 = vmatpush1.bf16.msra.mxu0 %v2796_v55  ;;  %1289 = vmatpush1.bf16.msra.mxu1 %v2799_v56  ;;  %v2891_v55 = vld [vmem:[#allocation8 + $0x2c] ss:$16 sps:$4 sm:$0xff]   ;;  %v2886_v56 = vld [vmem:[#allocation8 + $0x20] ss:$16 sps:$4 sm:$0xff]  }
 0x1d3   :  { %1208 = vmatprep.subr.bf16.mxu0 %v2804_v57  ;;  %1290 = vmatprep.subr.bf16.mxu1 %v2807_v58  ;;  %v2889_v57 = vld [vmem:[#allocation8 + $0x28] ss:$16 sps:$4 sm:$0xff]   ;;  %v2897_v58 = vld [vmem:[#allocation8 + $0x4c] ss:$16 sps:$4 sm:$0xff]  }
 0x1d6   :  { %1209 = vmatpush1.bf16.msra.mxu0 %v2802_v59  ;;  %1291 = vmatpush1.bf16.msra.mxu1 %v2805_v60  ;;  %v2892_v59 = vld [vmem:[#allocation8 + $0x40] ss:$16 sps:$4 sm:$0xff]   ;;  %v2895_v60 = vld [vmem:[#allocation8 + $0x48] ss:$16 sps:$4 sm:$0xff]  }
 0x1d7   :  { %1210 = vmatprep.subr.bf16.mxu0 %v2810_v61  ;;  %1292 = vmatprep.subr.bf16.mxu1 %v2813_v62  ;;  %v2900_v61 = vld [vmem:[#allocation8 + $0x64] ss:$16 sps:$4 sm:$0xff]   ;;  %v2903_v62 = vld [vmem:[#allocation8 + $0x6c] ss:$16 sps:$4 sm:$0xff]  }
 0x1da   :  { %1211 = vmatpush1.bf16.msra.mxu0 %v2808_v63  ;;  %1293 = vmatpush1.bf16.msra.mxu1 %v2811_v0  ;;  %v2898_v63 = vld [vmem:[#allocation8 + $0x60] ss:$16 sps:$4 sm:$0xff]   ;;  %v2901_v0 = vld [vmem:[#allocation8 + $0x68] ss:$16 sps:$4 sm:$0xff]  }
 0x1db   :  { %1212 = vmatprep.subr.bf16.mxu0 %v2816_v1  ;;  %1294 = vmatprep.subr.bf16.mxu1 %v2819_v2  ;;  %v2906_v1 = vld [vmem:[#allocation8 + $0x84] ss:$16 sps:$4 sm:$0xff]   ;;  %v2909_v2 = vld [vmem:[#allocation8 + $0x8c] ss:$16 sps:$4 sm:$0xff]  }
 0x1de   :  { %1213 = vmatpush1.bf16.msra.mxu0 %v2814_v3  ;;  %1295 = vmatpush1.bf16.msra.mxu1 %v2817_v4  ;;  %v2904_v3 = vld [vmem:[#allocation8 + $0x80] ss:$16 sps:$4 sm:$0xff]   ;;  %v2907_v4 = vld [vmem:[#allocation8 + $0x88] ss:$16 sps:$4 sm:$0xff]  }
 0x1df   :  { %1214 = vmatprep.subr.bf16.mxu0 %v2822_v5  ;;  %1296 = vmatprep.subr.bf16.mxu1 %v2825_v6  ;;  %v2912_v5 = vld [vmem:[#allocation8 + $0xa4] ss:$16 sps:$4 sm:$0xff]   ;;  %v2915_v6 = vld [vmem:[#allocation8 + $0xac] ss:$16 sps:$4 sm:$0xff]  }
 0x1e2   :  { %1215 = vmatpush1.bf16.msra.mxu0 %v2820_v7  ;;  %1297 = vmatpush1.bf16.msra.mxu1 %v2823_v8  ;;  %v2910_v7 = vld [vmem:[#allocation8 + $0xa0] ss:$16 sps:$4 sm:$0xff]   ;;  %v2913_v8 = vld [vmem:[#allocation8 + $0xa8] ss:$16 sps:$4 sm:$0xff]  }
 0x1e3   :  { %1216 = vmatprep.subr.bf16.mxu0 %v2828_v9  ;;  %1298 = vmatprep.subr.bf16.mxu1 %v2831_v10  ;;  %v2918_v9 = vld [vmem:[#allocation8 + $0xc4] ss:$16 sps:$4 sm:$0xff]   ;;  %v2921_v10 = vld [vmem:[#allocation8 + $0xcc] ss:$16 sps:$4 sm:$0xff]  }
 0x1e6   :  { %1217 = vmatpush1.bf16.msra.mxu0 %v2826_v11  ;;  %1299 = vmatpush1.bf16.msra.mxu1 %v2829_v12  ;;  %v2916_v11 = vld [vmem:[#allocation8 + $0xc0] ss:$16 sps:$4 sm:$0xff]   ;;  %v2919_v12 = vld [vmem:[#allocation8 + $0xc8] ss:$16 sps:$4 sm:$0xff]  }
 0x1e7   :  { %1218 = vmatprep.subr.bf16.mxu0 %v2834_v14  ;;  %1300 = vmatprep.subr.bf16.mxu1 %v2837_v15  ;;  %v2924_v14 = vld [vmem:[#allocation8 + $0xe4] ss:$16 sps:$4 sm:$0xff]   ;;  %v2927_v15 = vld [vmem:[#allocation8 + $0xec] ss:$16 sps:$4 sm:$0xff]  }
 0x1ea   :  { %1219 = vmatpush1.bf16.msra.mxu0 %v2832_v16  ;;  %1301 = vmatpush1.bf16.msra.mxu1 %v2835_v17  ;;  %v2922_v16 = vld [vmem:[#allocation8 + $0xe0] ss:$16 sps:$4 sm:$0xff]   ;;  %v2925_v17 = vld [vmem:[#allocation8 + $0xe8] ss:$16 sps:$4 sm:$0xff]  }
 0x1eb   :  { %1220 = vmatprep.subr.bf16.mxu0 %v2840_v18  ;;  %1302 = vmatprep.subr.bf16.mxu1 %v2843_v19  ;;  %v2930_v18 = vld [vmem:[#allocation8 + $0x104] ss:$16 sps:$4 sm:$0xff]   ;;  %v2933_v19 = vld [vmem:[#allocation8 + $0x10c] ss:$16 sps:$4 sm:$0xff]  }
 0x1ee   :  { %1221 = vmatpush1.bf16.msra.mxu0 %v2838_v20  ;;  %1303 = vmatpush1.bf16.msra.mxu1 %v2841_v21  ;;  %v2928_v20 = vld [vmem:[#allocation8 + $0x100] ss:$16 sps:$4 sm:$0xff]   ;;  %v2931_v21 = vld [vmem:[#allocation8 + $0x108] ss:$16 sps:$4 sm:$0xff]  }
 0x1ef   :  { %1222 = vmatprep.subr.bf16.mxu0 %v2846_v22  ;;  %1304 = vmatprep.subr.bf16.mxu1 %v2849_v23  ;;  %v2936_v22 = vld [vmem:[#allocation8 + $0x124] ss:$16 sps:$4 sm:$0xff]   ;;  %v2939_v23 = vld [vmem:[#allocation8 + $0x12c] ss:$16 sps:$4 sm:$0xff]  }
 0x1f2   :  { %1223 = vmatpush1.bf16.msra.mxu0 %v2844_v24  ;;  %1305 = vmatpush1.bf16.msra.mxu1 %v2847_v25  ;;  %v2934_v24 = vld [vmem:[#allocation8 + $0x120] ss:$16 sps:$4 sm:$0xff]   ;;  %v2937_v25 = vld [vmem:[#allocation8 + $0x128] ss:$16 sps:$4 sm:$0xff]  }
 0x1f3   :  { %1224 = vmatprep.subr.bf16.mxu0 %v2852_v26  ;;  %1306 = vmatprep.subr.bf16.mxu1 %v2855_v27  ;;  %v2942_v26 = vld [vmem:[#allocation8 + $0x144] ss:$16 sps:$4 sm:$0xff]   ;;  %v2945_v27 = vld [vmem:[#allocation8 + $0x14c] ss:$16 sps:$4 sm:$0xff]  }
 0x1f6   :  { %1225 = vmatpush1.bf16.msra.mxu0 %v2850_v28  ;;  %1307 = vmatpush1.bf16.msra.mxu1 %v2853_v29  ;;  %v2940_v28 = vld [vmem:[#allocation8 + $0x140] ss:$16 sps:$4 sm:$0xff]   ;;  %v2943_v29 = vld [vmem:[#allocation8 + $0x148] ss:$16 sps:$4 sm:$0xff]  }
 0x1f7   :  { %1226 = vmatprep.subr.bf16.mxu0 %v2858_v30  ;;  %1308 = vmatprep.subr.bf16.mxu1 %v2861_v32  ;;  %v2948_v30 = vld [vmem:[#allocation8 + $0x164] ss:$16 sps:$4 sm:$0xff]   ;;  %v2951_v32 = vld [vmem:[#allocation8 + $0x16c] ss:$16 sps:$4 sm:$0xff]  }
 0x1fa   :  { %1227 = vmatpush1.bf16.msra.mxu0 %v2856_v33  ;;  %1309 = vmatpush1.bf16.msra.mxu1 %v2859_v34  ;;  %v2946_v33 = vld [vmem:[#allocation8 + $0x160] ss:$16 sps:$4 sm:$0xff]   ;;  %v2949_v34 = vld [vmem:[#allocation8 + $0x168] ss:$16 sps:$4 sm:$0xff]  }
 0x1fb   :  { %1228 = vmatprep.subr.bf16.mxu0 %v2864_v35  ;;  %1310 = vmatprep.subr.bf16.mxu1 %v2867_v36  ;;  %v2954_v35 = vld [vmem:[#allocation8 + $0x184] ss:$16 sps:$4 sm:$0xff]   ;;  %v2957_v36 = vld [vmem:[#allocation8 + $0x18c] ss:$16 sps:$4 sm:$0xff]  }
 0x1fe   :  { %1229 = vmatpush1.bf16.msra.mxu0 %v2862_v37  ;;  %1311 = vmatpush1.bf16.msra.mxu1 %v2865_v38  ;;  %v2952_v37 = vld [vmem:[#allocation8 + $0x180] ss:$16 sps:$4 sm:$0xff]   ;;  %v2955_v38 = vld [vmem:[#allocation8 + $0x188] ss:$16 sps:$4 sm:$0xff]  }
 0x1ff   :  { %1230 = vmatprep.subr.bf16.mxu0 %v2870_v39  ;;  %1312 = vmatprep.subr.bf16.mxu1 %v2873_v40  ;;  %v2960_v39 = vld [vmem:[#allocation8 + $0x1a4] ss:$16 sps:$4 sm:$0xff]   ;;  %v2963_v40 = vld [vmem:[#allocation8 + $0x1ac] ss:$16 sps:$4 sm:$0xff]  }
 0x202   :  { %1231 = vmatpush1.bf16.msra.mxu0 %v2868_v41  ;;  %1313 = vmatpush1.bf16.msra.mxu1 %v2871_v42  ;;  %v2958_v41 = vld [vmem:[#allocation8 + $0x1a0] ss:$16 sps:$4 sm:$0xff]   ;;  %v2961_v42 = vld [vmem:[#allocation8 + $0x1a8] ss:$16 sps:$4 sm:$0xff]  }
 0x203   :  { %1232 = vmatprep.subr.bf16.mxu0 %v2876_v44  ;;  %1314 = vmatprep.subr.bf16.mxu1 %v2879_v45  ;;  %v2969_v44 = vld [vmem:[#allocation8 + $0x1cc] ss:$16 sps:$4 sm:$0xff]   ;;  %v2964_v45 = vld [vmem:[#allocation8 + $0x1c0] ss:$16 sps:$4 sm:$0xff]  }
 0x206   :  { %1233 = vmatpush1.bf16.msra.mxu0 %v2874_v46  ;;  %1315 = vmatpush1.bf16.msra.mxu1 %v2877_v47  ;;  %v2967_v46 = vld [vmem:[#allocation8 + $0x1c8] ss:$16 sps:$4 sm:$0xff]   ;;  %v2972_v47 = vld [vmem:[#allocation8 + $0x1e4] ss:$16 sps:$4 sm:$0xff]  }
 0x207   :  { %2127 = vmatprep.subr.bf16.mxu0 %v2882_v49  ;;  %2209 = vmatprep.subr.bf16.mxu1 %v2885_v50  ;;  %v2970_v49 = vld [vmem:[#allocation8 + $0x1e0] ss:$16 sps:$4 sm:$0xff]   ;;  %v2973_v50 = vld [vmem:[#allocation8 + $0x1e8] ss:$16 sps:$4 sm:$0xff]  }
 0x209   :  { %1235 = vmatmul.mubr.bf16.vlgmr.msra.gmra.mrb[4].mxu0 %v369_v53  ;;  %1317 = vmatmul.mubr.bf16.vlgmr.msra.gmra.mrb[4].mxu1 %v369_v53  ;;  %v3353_v53 = vshrl.u32 %v113_v13, 7 }
 0x20a   :  { %2128 = vmatpush1.bf16.msra.mxu0 %v2880_v51  ;;  %2210 = vmatpush1.bf16.msra.mxu1 %v2883_v52  ;;  %v2978_v51 = vld [vmem:[#allocation8 + $0x204] ss:$16 sps:$4 sm:$0xff]   ;;  %v2981_v52 = vld [vmem:[#allocation8 + $0x20c] ss:$16 sps:$4 sm:$0xff]  }
 0x20b   :  { %2129 = vmatprep.subr.bf16.mxu0 %v2888_v54  ;;  %2211 = vmatprep.subr.bf16.mxu1 %v2891_v55  ;;  %v3356_v54 = vsub.s32 0, %v3353_v53  ;;  %v3358_v55 = vld [vmem:[#allocation7] sm:$0xf] }
 0x20e   :  { %2130 = vmatpush1.bf16.msra.mxu0 %v2886_v56  ;;  %2212 = vmatpush1.bf16.msra.mxu1 %v2889_v57  ;;  %v3361_v56 = vsub.s32 1, %v3353_v53  ;;  %v3364_v57 = vsub.s32 3, %v3353_v53 }
 0x20f   :  { %2131 = vmatprep.subr.bf16.mxu0 %v2894_v31  ;;  %2213 = vmatprep.subr.bf16.mxu1 %v2897_v58  ;;  %v504_v31 = vrot.slane %v3358_v55, %v3356_v54 }
 0x210   :  { %v508_v58 = vrot.slane %v3358_v55, %v3361_v56  ;;  %v516_v13 = vrot.slane %v3358_v55, %v3364_v57 }
 0x212   :  { %2132 = vmatpush1.bf16.msra.mxu0 %v2892_v59  ;;  %2214 = vmatpush1.bf16.msra.mxu1 %v2895_v60 }
 0x213   :  { %2133 = vmatprep.subr.bf16.mxu0 %v2900_v61  ;;  %2215 = vmatprep.subr.bf16.mxu1 %v2903_v62 }
 0x216   :  { %2134 = vmatpush1.bf16.msra.mxu0 %v2898_v63  ;;  %2216 = vmatpush1.bf16.msra.mxu1 %v2901_v0 }
 0x217   :  { %2135 = vmatprep.subr.bf16.mxu0 %v2906_v1  ;;  %2217 = vmatprep.subr.bf16.mxu1 %v2909_v2 }
 0x21a   :  { %2136 = vmatpush1.bf16.msra.mxu0 %v2904_v3  ;;  %2218 = vmatpush1.bf16.msra.mxu1 %v2907_v4 }
 0x21b   :  { %2137 = vmatprep.subr.bf16.mxu0 %v2912_v5  ;;  %2219 = vmatprep.subr.bf16.mxu1 %v2915_v6 }
 0x21e   :  { %2138 = vmatpush1.bf16.msra.mxu0 %v2910_v7  ;;  %2220 = vmatpush1.bf16.msra.mxu1 %v2913_v8 }
 0x21f   :  { %2139 = vmatprep.subr.bf16.mxu0 %v2918_v9  ;;  %2221 = vmatprep.subr.bf16.mxu1 %v2921_v10 }
 0x222   :  { %2140 = vmatpush1.bf16.msra.mxu0 %v2916_v11  ;;  %2222 = vmatpush1.bf16.msra.mxu1 %v2919_v12 }
 0x223   :  { %2141 = vmatprep.subr.bf16.mxu0 %v2924_v14  ;;  %2223 = vmatprep.subr.bf16.mxu1 %v2927_v15  ;;  %v2976_v14 = vld [vmem:[#allocation8 + $0x200] ss:$16 sps:$4 sm:$0xff]   ;;  %v2979_v15 = vld [vmem:[#allocation8 + $0x208] ss:$16 sps:$4 sm:$0xff]  }
 0x226   :  { %2142 = vmatpush1.bf16.msra.mxu0 %v2922_v16  ;;  %2224 = vmatpush1.bf16.msra.mxu1 %v2925_v17  ;;  %v2984_v17 = vld [vmem:[#allocation8 + $0x224] ss:$16 sps:$4 sm:$0xff]  }
 0x227   :  { %2143 = vmatprep.subr.bf16.mxu0 %v2930_v18  ;;  %2225 = vmatprep.subr.bf16.mxu1 %v2933_v19  ;;  %v2987_v18 = vld [vmem:[#allocation8 + $0x22c] ss:$16 sps:$4 sm:$0xff]  }
 0x22a   :  { %2144 = vmatpush1.bf16.msra.mxu0 %v2928_v20  ;;  %2226 = vmatpush1.bf16.msra.mxu1 %v2931_v21  ;;  %v2982_v20 = vld [vmem:[#allocation8 + $0x220] ss:$16 sps:$4 sm:$0xff]   ;;  %v2985_v21 = vld [vmem:[#allocation8 + $0x228] ss:$16 sps:$4 sm:$0xff]  }
 0x22b   :  { %2145 = vmatprep.subr.bf16.mxu0 %v2936_v22  ;;  %2227 = vmatprep.subr.bf16.mxu1 %v2939_v23  ;;  %v2990_v22 = vld [vmem:[#allocation8 + $0x244] ss:$16 sps:$4 sm:$0xff]   ;;  %v2993_v23 = vld [vmem:[#allocation8 + $0x24c] ss:$16 sps:$4 sm:$0xff]  }
 0x22e   :  { %2146 = vmatpush1.bf16.msra.mxu0 %v2934_v24  ;;  %2228 = vmatpush1.bf16.msra.mxu1 %v2937_v25  ;;  %v2988_v24 = vld [vmem:[#allocation8 + $0x240] ss:$16 sps:$4 sm:$0xff]   ;;  %v2991_v25 = vld [vmem:[#allocation8 + $0x248] ss:$16 sps:$4 sm:$0xff]  }
 0x22f   :  { %2147 = vmatprep.subr.bf16.mxu0 %v2942_v26  ;;  %2229 = vmatprep.subr.bf16.mxu1 %v2945_v27  ;;  %v2996_v26 = vld [vmem:[#allocation8 + $0x264] ss:$16 sps:$4 sm:$0xff]   ;;  %v2999_v27 = vld [vmem:[#allocation8 + $0x26c] ss:$16 sps:$4 sm:$0xff]  }
 0x232   :  { %2148 = vmatpush1.bf16.msra.mxu0 %v2940_v28  ;;  %2230 = vmatpush1.bf16.msra.mxu1 %v2943_v29  ;;  %v2994_v28 = vld [vmem:[#allocation8 + $0x260] ss:$16 sps:$4 sm:$0xff]   ;;  %v2997_v29 = vld [vmem:[#allocation8 + $0x268] ss:$16 sps:$4 sm:$0xff]  }
 0x233   :  { %2149 = vmatprep.subr.bf16.mxu0 %v2948_v30  ;;  %2231 = vmatprep.subr.bf16.mxu1 %v2951_v32  ;;  %v3002_v30 = vld [vmem:[#allocation8 + $0x284] ss:$16 sps:$4 sm:$0xff]   ;;  %v3005_v32 = vld [vmem:[#allocation8 + $0x28c] ss:$16 sps:$4 sm:$0xff]  }
 0x236   :  { %2150 = vmatpush1.bf16.msra.mxu0 %v2946_v33  ;;  %2232 = vmatpush1.bf16.msra.mxu1 %v2949_v34  ;;  %v3000_v33 = vld [vmem:[#allocation8 + $0x280] ss:$16 sps:$4 sm:$0xff]   ;;  %v3003_v34 = vld [vmem:[#allocation8 + $0x288] ss:$16 sps:$4 sm:$0xff]  }
 0x237   :  { %2151 = vmatprep.subr.bf16.mxu0 %v2954_v35  ;;  %2233 = vmatprep.subr.bf16.mxu1 %v2957_v36  ;;  %v3008_v35 = vld [vmem:[#allocation8 + $0x2a4] ss:$16 sps:$4 sm:$0xff]   ;;  %v3011_v36 = vld [vmem:[#allocation8 + $0x2ac] ss:$16 sps:$4 sm:$0xff]  }
 0x23a   :  { %2152 = vmatpush1.bf16.msra.mxu0 %v2952_v37  ;;  %2234 = vmatpush1.bf16.msra.mxu1 %v2955_v38  ;;  %v3006_v37 = vld [vmem:[#allocation8 + $0x2a0] ss:$16 sps:$4 sm:$0xff]   ;;  %v3009_v38 = vld [vmem:[#allocation8 + $0x2a8] ss:$16 sps:$4 sm:$0xff]  }
 0x23b   :  { %2153 = vmatprep.subr.bf16.mxu0 %v2960_v39  ;;  %2235 = vmatprep.subr.bf16.mxu1 %v2963_v40  ;;  %v3014_v39 = vld [vmem:[#allocation8 + $0x2c4] ss:$16 sps:$4 sm:$0xff]   ;;  %v3017_v40 = vld [vmem:[#allocation8 + $0x2cc] ss:$16 sps:$4 sm:$0xff]  }
 0x23e   :  { %2154 = vmatpush1.bf16.msra.mxu0 %v2958_v41  ;;  %2236 = vmatpush1.bf16.msra.mxu1 %v2961_v42  ;;  %v3012_v41 = vld [vmem:[#allocation8 + $0x2c0] ss:$16 sps:$4 sm:$0xff]   ;;  %v3015_v42 = vld [vmem:[#allocation8 + $0x2c8] ss:$16 sps:$4 sm:$0xff]  }
 0x23f   :  { %2155 = vmatprep.subr.bf16.mxu0 %v2966_v43  ;;  %2237 = vmatprep.subr.bf16.mxu1 %v2969_v44  ;;  %v3020_v43 = vld [vmem:[#allocation8 + $0x2e4] ss:$16 sps:$4 sm:$0xff]   ;;  %v3023_v44 = vld [vmem:[#allocation8 + $0x2ec] ss:$16 sps:$4 sm:$0xff]  }
 0x242   :  { %2156 = vmatpush1.bf16.msra.mxu0 %v2964_v45  ;;  %2238 = vmatpush1.bf16.msra.mxu1 %v2967_v46  ;;  %v3018_v45 = vld [vmem:[#allocation8 + $0x2e0] ss:$16 sps:$4 sm:$0xff]   ;;  %v3021_v46 = vld [vmem:[#allocation8 + $0x2e8] ss:$16 sps:$4 sm:$0xff]  }
 0x243   :  { %2157 = vmatprep.subr.bf16.mxu0 %v2972_v47  ;;  %2239 = vmatprep.subr.bf16.mxu1 %v2975_v48  ;;  %v3026_v47 = vld [vmem:[#allocation8 + $0x304] ss:$16 sps:$4 sm:$0xff]   ;;  %v3029_v48 = vld [vmem:[#allocation8 + $0x30c] ss:$16 sps:$4 sm:$0xff]  }
 0x246   :  { %2158 = vmatpush1.bf16.msra.mxu0 %v2970_v49  ;;  %2240 = vmatpush1.bf16.msra.mxu1 %v2973_v50  ;;  %v3024_v49 = vld [vmem:[#allocation8 + $0x300] ss:$16 sps:$4 sm:$0xff]   ;;  %v3027_v50 = vld [vmem:[#allocation8 + $0x308] ss:$16 sps:$4 sm:$0xff]  }
 0x247   :  { %2168 = vmatprep.subr.bf16.mxu0 %v2978_v51  ;;  %2250 = vmatprep.subr.bf16.mxu1 %v2981_v52  ;;  %v3032_v51 = vld [vmem:[#allocation8 + $0x324] ss:$16 sps:$4 sm:$0xff]   ;;  %v3035_v52 = vld [vmem:[#allocation8 + $0x32c] ss:$16 sps:$4 sm:$0xff]  }
 0x2dc   :  { %v1236_v59 = vpop.f32.mrb[4].mxu0  ;;  %v3372_v60 = vpop.f32.mrb[4].mxu1 }
 0x2dd   :  { %v2630_v61 = vadd.f32 %v1236_v59, %v504_v31  ;;  %v1238_v62 = vpop.f32.mrb[5].mxu0  ;;  %v1320_v63 = vpop.f32.mrb[5].mxu1  ;;  %v3030_v31 = vld [vmem:[#allocation8 + $0x320] ss:$16 sps:$4 sm:$0xff]   ;;  %v3041_v59 = vld [vmem:[#allocation8 + $0x34c] ss:$16 sps:$4 sm:$0xff]  }
 0x2de   :  { %v2631_v0 = vadd.f32 %v1238_v62, %v508_v58  ;;  %v2633_v1 = vadd.f32 %v1320_v63, %v516_v13  ;;  %v1240_v2 = vpop.f32.mrb[6].mxu0  ;;  %v1322_v3 = vpop.f32.mrb[6].mxu1  ;;  %v3033_v58 = vld [vmem:[#allocation8 + $0x328] ss:$16 sps:$4 sm:$0xff]   ;;  %v3038_v13 = vld [vmem:[#allocation8 + $0x344] ss:$16 sps:$4 sm:$0xff]  }
 0x2df   :  { %v1325_v4 = vmul.f32 0.2, %v2630_v61  ;;  %v1241_v5 = vpop.f32.mrb[7].mxu0  ;;  %v1323_v6 = vpop.f32.mrb[7].mxu1  ;;  %v3039_v62 = vld [vmem:[#allocation8 + $0x348] ss:$16 sps:$4 sm:$0xff]  }
 0x2e0   :  { %v1326_v7 = vmul.f32 0.2, %v2631_v0  ;;  %v1328_v8 = vmul.f32 0.2, %v2633_v1  ;;  %v3044_v63 = vld [vmem:[#allocation8 + $0x364] ss:$16 sps:$4 sm:$0xff]  }
 0x2e1   :  { %v1329_v9 = vmax.f32 %v2630_v61, %v1325_v4  ;;  %v3036_v61 = vld [vmem:[#allocation8 + $0x340] ss:$16 sps:$4 sm:$0xff]   ;;  %v3045_v2 = vld [vmem:[#allocation8 + $0x368] ss:$16 sps:$4 sm:$0xff]   ;;  %v3375_v3 = vsub.s32 2, %v3353_v53 }
 0x2e2   :  { %v1330_v10 = vmax.f32 %v2631_v0, %v1326_v7  ;;  %v1332_v11 = vmax.f32 %v2633_v1, %v1328_v8  ;;  %v3047_v0 = vld [vmem:[#allocation8 + $0x36c] ss:$16 sps:$4 sm:$0xff]   ;;  %v3042_v1 = vld [vmem:[#allocation8 + $0x360] ss:$16 sps:$4 sm:$0xff]   ;;  %v3050_v4 = vld [vmem:[#allocation8 + $0x384] ss:$16 sps:$4 sm:$0xff]  }
 0x2e3   :  { %v1333_v16 = vpack.c.bf16 %v1329_v9, %v1329_v9  ;;  %v3053_v5 = vld [vmem:[#allocation8 + $0x38c] ss:$16 sps:$4 sm:$0xff]   ;;  %v3048_v6 = vld [vmem:[#allocation8 + $0x380] ss:$16 sps:$4 sm:$0xff]   ;;  %v3051_v7 = vld [vmem:[#allocation8 + $0x388] ss:$16 sps:$4 sm:$0xff]   ;;  %v512_v8 = vrot.slane %v3358_v55, %v3375_v3 }
 0x2e4   :  { %v1334_v12 = vpack.c.bf16 %v1330_v10, %v1330_v10  ;;  %v1336_v19 = vpack.c.bf16 %v1332_v11, %v1332_v11  ;;  %v3056_v9 = vld [vmem:[#allocation8 + $0x3a4] ss:$16 sps:$4 sm:$0xff]   ;;  %v3059_v10 = vld [vmem:[#allocation8 + $0x3ac] ss:$16 sps:$4 sm:$0xff]   ;;  %v3054_v11 = vld [vmem:[#allocation8 + $0x3a0] ss:$16 sps:$4 sm:$0xff]  }
 0x2e5   :  { %v3057_v53 = vld [vmem:[#allocation8 + $0x3a8] ss:$16 sps:$4 sm:$0xff]   ;;  %v3068_v55 = vld [vmem:[#allocation8 + $0x3e4] ss:$16 sps:$4 sm:$0xff]  }
 0x2e6   :  { %2159 = vmatprep.mubr.bf16.mxu0 %v1334_v12  ;;  %2241 = vmatprep.mubr.bf16.mxu1 %v1334_v12  ;;  %v2632_v12 = vadd.f32 %v3372_v60, %v512_v8 }
 0x2e7   :  { %2160 = vmatmul.mubr.bf16.vlgmr.msra.gmra.mrb[8].mxu0 %v1333_v16  ;;  %2242 = vmatmul.mubr.bf16.vlgmr.msra.gmra.mrb[8].mxu1 %v1333_v16  ;;  %v3060_v16 = vld [vmem:[#allocation8 + $0x3c0] ss:$16 sps:$4 sm:$0xff]  }
 0x2e8   :  { %2169 = vmatpush1.bf16.msra.mxu0 %v2976_v14  ;;  %2251 = vmatpush1.bf16.msra.mxu1 %v2979_v15  ;;  %v3062_v14 = vld [vmem:[#allocation8 + $0x3c4] ss:$16 sps:$4 sm:$0xff]   ;;  %v3065_v15 = vld [vmem:[#allocation8 + $0x3cc] ss:$16 sps:$4 sm:$0xff]  }
 0x2e9   :  { %2200 = vmatprep.mubr.bf16.mxu0 %v1336_v19  ;;  %2282 = vmatprep.mubr.bf16.mxu1 %v1336_v19  ;;  %v3071_v19 = vld [vmem:[#allocation8 + $0x3ec] ss:$16 sps:$4 sm:$0xff]  }
 0x2ea   :  { %2170 = vmatprep.subr.bf16.mxu0 %v2984_v17  ;;  %2252 = vmatprep.subr.bf16.mxu1 %v2987_v18  ;;  %v3063_v17 = vld [vmem:[#allocation8 + $0x3c8] ss:$16 sps:$4 sm:$0xff]   ;;  %v1327_v18 = vmul.f32 0.2, %v2632_v12 }
 0x2ec   :  { %2171 = vmatpush1.bf16.msra.mxu0 %v2982_v20  ;;  %2253 = vmatpush1.bf16.msra.mxu1 %v2985_v21  ;;  %v3066_v20 = vld [vmem:[#allocation8 + $0x3e0] ss:$16 sps:$4 sm:$0xff]   ;;  %v3069_v21 = vld [vmem:[#allocation8 + $0x3e8] ss:$16 sps:$4 sm:$0xff]  }
 0x2ed   :  { %2172 = vmatprep.subr.bf16.mxu0 %v2990_v22  ;;  %2254 = vmatprep.subr.bf16.mxu1 %v2993_v23  ;;  %v1331_v22 = vmax.f32 %v2632_v12, %v1327_v18  ;;  %v1465_v23 = vld [vmem:[#allocation10] sm:$0xf] }
 0x2ef   :  { %v1335_v60 = vpack.c.bf16 %v1331_v22, %v1331_v22 }
 0x2f0   :  { %2173 = vmatpush1.bf16.msra.mxu0 %v2988_v24  ;;  %2255 = vmatpush1.bf16.msra.mxu1 %v2991_v25  ;;  %v1470_v24 = vrot.slane %v1465_v23, %v3356_v54  ;;  %v1478_v25 = vrot.slane %v1465_v23, %v3375_v3 }
 0x2f1   :  { %2174 = vmatprep.subr.bf16.mxu0 %v2996_v26  ;;  %2256 = vmatprep.subr.bf16.mxu1 %v2999_v27  ;;  %v1474_v26 = vrot.slane %v1465_v23, %v3361_v56  ;;  %v1482_v27 = vrot.slane %v1465_v23, %v3364_v57 }
 0x2f4   :  { %2175 = vmatpush1.bf16.msra.mxu0 %v2994_v28  ;;  %2257 = vmatpush1.bf16.msra.mxu1 %v2997_v29  ;;  %v2299_v29 = vld [vmem:[%s3402_s8] sm:$0xf] }
 0x2f5   :  { %2176 = vmatprep.subr.bf16.mxu0 %v3002_v30  ;;  %2258 = vmatprep.subr.bf16.mxu1 %v3005_v32 }
 0x2f8   :  { %2177 = vmatpush1.bf16.msra.mxu0 %v3000_v33  ;;  %2259 = vmatpush1.bf16.msra.mxu1 %v3003_v34 }
 0x2f9   :  { %2178 = vmatprep.subr.bf16.mxu0 %v3008_v35  ;;  %2260 = vmatprep.subr.bf16.mxu1 %v3011_v36 }
 0x2fc   :  { %2179 = vmatpush1.bf16.msra.mxu0 %v3006_v37  ;;  %2261 = vmatpush1.bf16.msra.mxu1 %v3009_v38 }
 0x2fd   :  { %2180 = vmatprep.subr.bf16.mxu0 %v3014_v39  ;;  %2262 = vmatprep.subr.bf16.mxu1 %v3017_v40 }
 0x300   :  { %2181 = vmatpush1.bf16.msra.mxu0 %v3012_v41  ;;  %2263 = vmatpush1.bf16.msra.mxu1 %v3015_v42  ;;  %v2304_v41 = vrot.slane %v2299_v29, %v3356_v54 }
 0x301   :  { %2182 = vmatprep.subr.bf16.mxu0 %v3020_v43  ;;  %2264 = vmatprep.subr.bf16.mxu1 %v3023_v44 }
 0x304   :  { %2183 = vmatpush1.bf16.msra.mxu0 %v3018_v45  ;;  %2265 = vmatpush1.bf16.msra.mxu1 %v3021_v46  ;;  %v2308_v46 = vrot.slane %v2299_v29, %v3361_v56 }
 0x305   :  { %2184 = vmatprep.subr.bf16.mxu0 %v3026_v47  ;;  %2266 = vmatprep.subr.bf16.mxu1 %v3029_v48 }
 0x308   :  { %2185 = vmatpush1.bf16.msra.mxu0 %v3024_v49  ;;  %2267 = vmatpush1.bf16.msra.mxu1 %v3027_v50  ;;  %v2312_v50 = vrot.slane %v2299_v29, %v3375_v3 }
 0x309   :  { %2186 = vmatprep.subr.bf16.mxu0 %v3032_v51  ;;  %2268 = vmatprep.subr.bf16.mxu1 %v3035_v52 }
 0x30c   :  { %2187 = vmatpush1.bf16.msra.mxu0 %v3030_v31  ;;  %2269 = vmatpush1.bf16.msra.mxu1 %v3033_v58 }
 0x30d   :  { %2188 = vmatprep.subr.bf16.mxu0 %v3038_v13  ;;  %2270 = vmatprep.subr.bf16.mxu1 %v3041_v59  ;;  %v2316_v13 = vrot.slane %v2299_v29, %v3364_v57 }
 0x310   :  { %2189 = vmatpush1.bf16.msra.mxu0 %v3036_v61  ;;  %2271 = vmatpush1.bf16.msra.mxu1 %v3039_v62 }
 0x311   :  { %2190 = vmatprep.subr.bf16.mxu0 %v3044_v63  ;;  %2272 = vmatprep.subr.bf16.mxu1 %v3047_v0  ;;  %v2628_v0 = vld [vmem:[#allocation2] ss:$0 sm:$0xff] }
 0x314   :  { %2191 = vmatpush1.bf16.msra.mxu0 %v3042_v1  ;;  %2273 = vmatpush1.bf16.msra.mxu1 %v3045_v2 }
 0x315   :  { %2192 = vmatprep.subr.bf16.mxu0 %v3050_v4  ;;  %2274 = vmatprep.subr.bf16.mxu1 %v3053_v5 }
 0x318   :  { %2193 = vmatpush1.bf16.msra.mxu0 %v3048_v6  ;;  %2275 = vmatpush1.bf16.msra.mxu1 %v3051_v7 }
 0x319   :  { %2194 = vmatprep.subr.bf16.mxu0 %v3056_v9  ;;  %2276 = vmatprep.subr.bf16.mxu1 %v3059_v10 }
 0x31c   :  { %2195 = vmatpush1.bf16.msra.mxu0 %v3054_v11  ;;  %2277 = vmatpush1.bf16.msra.mxu1 %v3057_v53 }
 0x31d   :  { %2196 = vmatprep.subr.bf16.mxu0 %v3062_v14  ;;  %2278 = vmatprep.subr.bf16.mxu1 %v3065_v15 }
 0x320   :  { %2197 = vmatpush1.bf16.msra.mxu0 %v3060_v16  ;;  %2279 = vmatpush1.bf16.msra.mxu1 %v3063_v17 }
 0x321   :  { %2198 = vmatprep.subr.bf16.mxu0 %v3068_v55  ;;  %2280 = vmatprep.subr.bf16.mxu1 %v3071_v19 }
 0x324   :  { %2199 = vmatpush1.bf16.msra.mxu0 %v3066_v20  ;;  %2281 = vmatpush1.bf16.msra.mxu1 %v3069_v21 }
 0x327   :  { %2201 = vmatmul.mubr.bf16.vlgmr.msra.gmra.mrb[8].mxu0 %v1335_v60  ;;  %2283 = vmatmul.mubr.bf16.vlgmr.msra.gmra.mrb[8].mxu1 %v1335_v60 }
 0x3fa   :  { %v2202_v28 = vpop.f32.mrb[8].mxu0  ;;  %v2284_v30 = vpop.f32.mrb[8].mxu1 }
 0x3fb   :  { %v2634_v32 = vadd.f32 %v2202_v28, %v1470_v24  ;;  %v2636_v33 = vadd.f32 %v2284_v30, %v1478_v25  ;;  %v2204_v34 = vpop.f32.mrb[9].mxu0  ;;  %v2286_v35 = vpop.f32.mrb[9].mxu1 }
 0x3fc   :  { %v2635_v36 = vadd.f32 %v2204_v34, %v1474_v26  ;;  %v2637_v37 = vadd.f32 %v2286_v35, %v1482_v27  ;;  %v2206_v38 = vpop.f32.mrb[10].mxu0  ;;  %v2288_v39 = vpop.f32.mrb[10].mxu1 }
 0x3fd   :  { %v2291_v40 = vmul.f32 0.2, %v2634_v32  ;;  %v2293_v42 = vmul.f32 0.2, %v2636_v33  ;;  %v2207_v43 = vpop.f32.mrb[11].mxu0  ;;  %v2289_v44 = vpop.f32.mrb[11].mxu1 }
 0x3fe   :  { %v2292_v45 = vmul.f32 0.2, %v2635_v36  ;;  %v2294_v47 = vmul.f32 0.2, %v2637_v37 }
 0x3ff   :  { %v2295_v48 = vmax.f32 %v2634_v32, %v2291_v40  ;;  %v2297_v49 = vmax.f32 %v2636_v33, %v2293_v42 }
 0x400   :  { %v2296_v51 = vmax.f32 %v2635_v36, %v2292_v45  ;;  %v2298_v58 = vmax.f32 %v2637_v37, %v2294_v47 }
 0x401   :  { %v2321_v52 = vmul.f32 %v2304_v41, %v2295_v48  ;;  %v2323_v59 = vmul.f32 %v2312_v50, %v2297_v49 }
 0x402   :  { %v2322_v31 = vmul.f32 %v2308_v46, %v2296_v51  ;;  %v2324_v54 = vmul.f32 %v2316_v13, %v2298_v58 }
 0x404   :  { %v2325_v61 = vadd.f32 %v2322_v31, %v2321_v52 }
 0x406   :  { %v2326_v62 = vadd.f32 %v2325_v61, %v2323_v59 }
 0x408   :  { %v2327_v63 = vadd.f32 %v2326_v62, %v2324_v54 }
 0x40a   :  { %2328 = vadd.xlane.f32.xlu0 %v2327_v63 }
 0x497   :  { %v2329_v1 = vpop.xlane.xlu0 %2328 }
 0x498   :  { %v2337_v56 = vadd.f32 %v2628_v0, %v2329_v1 }
 0x49a   :  { %v2629_v2 = vmul.f32 -1.442695, %v2337_v56 }
 0x49c   :  { %3072 = vpow2.f32 %v2629_v2 }
 0x4a6   :  { %v3073_v4 = vpop.eup %3072 }
 0x4a7   :  { %v2341_v5 = vadd.f32 1.0, %v3073_v4 }
 0x4a9   :  { %3074 = vrcp.f32 %v2341_v5 }
 0x4b3   :  { %v3075_v3 = vpop.eup %3074 }
 0x4b4   :  { %2345 = vst.msk [vmem:[%s3404_s10] sm:$0xff] %vm2344_vm4, %v3075_v3 }
 0x4b5   :  { %2350 = vsyncpa [#allocation4], 1 }
 0x4b6   :  { %2351 = vsyncpa [#allocation6], 1 }
 0x4b7   :  { %2352 = vsyncpa [#allocation9], 1 }

</bundles_post_ra>
